<compile_context>
chip_gen: v7x
topology: tpu7x:2x2x1
jax: 0.10.0
libtpu: 0.0.40
codegen_flags: <defaults>
</compile_context>

<pallas_src>
import functools
import math

import numpy as np
import jax
import jax.numpy as jnp
from jax import lax
from jax.experimental import pallas as pl
from jax.experimental.pallas import tpu as pltpu

EPS = 1e-5
NEG_BIG = -1e30   # bias for padded (fake) classifier columns -> vanish in softmax


# ----------------------------------------------------------------------------
# Single fused Pallas kernel: L x (conv+BN+ReLU+pool as matmul) + Linear + log_softmax
# ----------------------------------------------------------------------------
def _fused_net_kernel(*refs, L):
    """refs = (x, T_1, shift_1, ..., T_L, shift_L, clf_w, clf_b, out).

    x      : (Bt, K_0)    f32   lane-dense NCHW-flattened activations (zero-padded K)
    T_i    : (K_i, N_i)   bf16  conv+pad+BN-scale folded operator, columns ordered
                                [even-w block | odd-w block]
    shift_i: (1, N_i)     f32   BN shift (+ conv bias) per output column
    clf_w  : (dim, NCp)   bf16  pre-transposed classifier weight, zero-padded columns
    clf_b  : (1, NCp)     f32   classifier bias, -1e30 on padded columns
    out    : (Bt, NCp)    f32   log-probabilities (real classes in [:, :n_classes])
    """
    x_ref = refs[0]
    o_ref = refs[-1]

    a = x_ref[...]                                              # (Bt, K_0) f32
    for i in range(L):
        t = refs[1 + 2 * i][...]                                # (K_i, N_i) bf16
        shift = refs[2 + 2 * i][...]                            # (1, N_i)   f32
        # conv (+pad) + BN-scale as a single bf16 MXU matmul (f32 accumulation),
        # BN-shift as the f32 bias.
        y = jnp.dot(a.astype(jnp.bfloat16), t,
                    preferred_element_type=jnp.float32) + shift
        y = jnp.maximum(y, 0.0)                                 # ReLU (f32)
        # MaxPool(1,2): partner columns live in the two contiguous 128-aligned halves.
        half = y.shape[1] // 2
        a = jnp.maximum(y[:, :half], y[:, half:])               # (Bt, N_i/2)

    wc = refs[1 + 2 * L][...]                                   # (dim, NCp) bf16
    bc = refs[2 + 2 * L][...]                                   # (1, NCp)   f32
    logits = jnp.dot(a.astype(jnp.bfloat16), wc,
                     preferred_element_type=jnp.float32) + bc
    m = jnp.max(logits, axis=-1, keepdims=True)                 # pads are -1e30 -> ignored
    s = logits - m
    o_ref[...] = s - jnp.log(jnp.sum(jnp.exp(s), axis=-1, keepdims=True))


# ----------------------------------------------------------------------------
# One-time host-side parameter preparation (hoisted out of the forward pass)
# ----------------------------------------------------------------------------
def _conv_bn_pool_matrix(wOIHW, bias, gamma, beta, mean, var, Cin, H, Win):
    """Build the per-layer matmul operator (numpy, f32).

    Returns (T, shift, H_out, W_pooled):
      T    : (Cin*H*Win, Cout*H_out*2*W_pooled) — conv-with-zero-padding as a dense
             matrix, BN scale folded in, output columns ordered
             [even-w positions | odd-w positions] (trailing odd column dropped,
             matching MaxPool2d((1,2)) semantics).
      shift: (1, Ncols) — beta - mean*scale + conv_bias*scale, same column order.
    """
    w = np.asarray(wOIHW, np.float32)                 # (Cout, Cin, KH, KW)
    Cout, Cin_w, KH, KW = w.shape
    assert Cin_w == Cin
    ph, pw = KH // 2, KW // 2                         # padding=(1, kernel_sz//2)
    Hout = H + 2 * ph - KH + 1
    Wout = Win + 2 * pw - KW + 1
    Wp = Wout // 2                                    # pool drops trailing odd col

    # Dense operator: rows = (cin, hi, wi), cols = (cout, ho, wo)
    T = np.zeros((Cin, H, Win, Cout, Hout, Wout), np.float32)
    for kh in range(KH):
        for kw in range(KW):
            # selector: hi = ho + kh - ph   (out-of-range => zero padding)
            Sh = np.zeros((H, Hout), np.float32)
            ho = np.arange(Hout)
            hi = ho + kh - ph
            mh = (hi >= 0) & (hi < H)
            Sh[hi[mh], ho[mh]] = 1.0
            Sw = np.zeros((Win, Wout), np.float32)
            wo = np.arange(Wout)
            wi = wo + kw - pw
            mw = (wi >= 0) & (wi < Win)
            Sw[wi[mw], wo[mw]] = 1.0
            T += np.einsum('oc,hH,wW->chwoHW', w[:, :, kh, kw], Sh, Sw)

    scale = np.asarray(gamma, np.float32) / np.sqrt(np.asarray(var, np.float32) + EPS)
    shift_c = (np.asarray(beta, np.float32)
               - np.asarray(mean, np.float32) * scale
               + np.asarray(bias, np.float32) * scale)

    T *= scale[None, None, None, :, None, None]       # fold BN scale into operator

    rows = Cin * H * Win
    T_even = np.ascontiguousarray(T[..., 0:2 * Wp:2]).reshape(rows, Cout * Hout * Wp)
    T_odd = np.ascontiguousarray(T[..., 1:2 * Wp:2]).reshape(rows, Cout * Hout * Wp)
    T2 = np.concatenate([T_even, T_odd], axis=1)      # (rows, Cout*Hout*2*Wp)

    sh_half = np.repeat(shift_c, Hout * Wp)
    shift = np.concatenate([sh_half, sh_half])[None, :].astype(np.float32)
    return T2, shift, Hout, Wp


def prepare_pallas_params(params, n_chan, time_step):
    """Precompute all kernel operands once (nothing is recomputed per forward)."""
    Cin, H, W = 1, n_chan, time_step                  # module always starts with C=1
    layers = []
    for li, p in enumerate(params["convs"]):
        T, shift, H, W = _conv_bn_pool_matrix(
            np.asarray(p["w"]), np.asarray(p["b"]), np.asarray(p["gamma"]),
            np.asarray(p["beta"]), np.asarray(p["mean"]), np.asarray(p["var"]),
            Cin, H, W)
        if li == 0:
            # Pad the layer-1 contraction dim to a full 128-lane width (zero rows);
            # the wrapper pads the input columns to match.
            pad = (-T.shape[0]) % 128
            if pad:
                T = np.pad(T, ((0, pad), (0, 0)))
        layers.append((jnp.asarray(T).astype(jnp.bfloat16),     # bf16 MXU operand
                       jnp.asarray(shift, dtype=jnp.float32)))  # f32 shift
        Cin = int(np.asarray(p["w"]).shape[0])

    n_classes = int(np.asarray(params["clf_b"]).shape[-1])
    ncp = ((n_classes + 127) // 128) * 128            # lane-dense classifier width
    wT = np.asarray(params["clf_w"], np.float32).T    # (dim, n_classes)
    wT = np.pad(wT, ((0, 0), (0, ncp - n_classes)))   # zero columns for fake classes
    bT = np.full((1, ncp), NEG_BIG, np.float32)       # fake classes vanish in softmax
    bT[0, :n_classes] = np.asarray(params["clf_b"], np.float32)

    return dict(layers=layers,
                clf_w=jnp.asarray(wT).astype(jnp.bfloat16),
                clf_b=jnp.asarray(bT),
                din=int(layers[0][0].shape[0]),
                n_classes=n_classes,
                n_classes_padded=ncp)


# ----------------------------------------------------------------------------
# Forward passes
# ----------------------------------------------------------------------------
def forward_pallas(x, pp):
    # PyTorch: if x.ndim == 3 -> unsqueeze channel dim (NCHW, C=1)
    if x.ndim == 3:
        x = x[:, None, :, :]
    B = x.shape[0]
    xf = x.reshape(B, -1).astype(jnp.float32)         # NCHW flatten == T row order
    din = pp["din"]
    if xf.shape[1] < din:                             # lane-pad layer-1 input columns
        xf = jnp.pad(xf, ((0, 0), (0, din - xf.shape[1])))

    layers = pp["layers"]
    L = len(layers)
    nc = pp["n_classes"]
    ncp = pp["n_classes_padded"]

    # Batch tiling: one step for small B (rounded to a sublane multiple); 256-row
    # tiles for large B so the 256-wide MXU on v6e/v7x is filled and the parallel
    # axis has >=2 steps to use both v7x TensorCores; capped at 256 so per-step f32
    # intermediates stay small (also fine on v5e's 128-wide MXU).
    bb = ((B + 7) // 8) * 8 if B <= 256 else 256
    Bp = ((B + bb - 1) // bb) * bb
    if Bp != B:
        xf = jnp.pad(xf, ((0, Bp - B), (0, 0)))
    grid = (Bp // bb,)

    weight_args = []
    for (T, shift) in layers:
        weight_args += [T, shift]
    weight_args += [pp["clf_w"], pp["clf_b"]]

    # VMEM size guard: dense unrolled-conv operators grow quadratically with layer
    # width; v7x only has 64 MiB VMEM (32 MiB scoped default).
    weight_bytes = sum(int(np.prod(w.shape)) * w.dtype.itemsize for w in weight_args)
    max_n = max(int(T.shape[1]) for T, _ in layers)
    act_bytes = 4 * bb * (din + 2 * max_n + 2 * ncp)          # x + intermediates + out
    vmem_est = 2 * weight_bytes + 2 * 4 * bb * (din + ncp) + act_bytes
    if vmem_est > 48 * 1024 * 1024:
        # TODO(synk): K-tile the contraction (extra grid axis + f32 VMEM accumulator
        # with pl.when init/finalize) for configs whose dense T_i no longer fit VMEM.
        raise NotImplementedError("unrolled-conv operators too large for v7x VMEM")
    cp_kwargs = dict(dimension_semantics=("parallel",))
    if vmem_est > 24 * 1024 * 1024:
        cp_kwargs["vmem_limit_bytes"] = min(int(vmem_est * 5 // 4), 100 * 1024 * 1024)

    def run(weight_mode):
        wkw = {} if weight_mode is None else {"pipeline_mode": weight_mode}
        in_specs = [pl.BlockSpec((bb, din), lambda i: (i, 0))]
        for (T, shift) in layers:
            in_specs.append(pl.BlockSpec(T.shape, lambda i: (0, 0), **wkw))
            in_specs.append(pl.BlockSpec(shift.shape, lambda i: (0, 0), **wkw))
        in_specs.append(pl.BlockSpec(pp["clf_w"].shape, lambda i: (0, 0), **wkw))
        in_specs.append(pl.BlockSpec(pp["clf_b"].shape, lambda i: (0, 0), **wkw))
        return pl.pallas_call(
            functools.partial(_fused_net_kernel, L=L),
            out_shape=jax.ShapeDtypeStruct((Bp, ncp), jnp.float32),
            grid=grid,
            in_specs=in_specs,
            out_specs=pl.BlockSpec((bb, ncp), lambda i: (i, 0)),
            compiler_params=pltpu.CompilerParams(**cp_kwargs),
        )(xf, *weight_args)

    try:
        # Grid-invariant weights never get re-fetched; single-buffer them to free
        # the redundant second pipeline buffer (most relevant for v7x's 64 MiB VMEM).
        out = run(pl.Buffered(buffer_count=1))
    except Exception:
        # Fallback for jax versions where BlockSpec.pipeline_mode is unavailable.
        out = run(None)

    # TODO(synk): nn.Dropout(p=0.8) is identity in eval mode; no RNG masking here.
    return out[:B, :nc]


def forward_reference(x, params, kernel_sz):
    """Pure-JAX/XLA f32 reference of the same math (eval-mode PyTorch semantics)."""
    if x.ndim == 3:
        x = x[:, None, :, :]
    for p in params["convs"]:
        x = lax.conv_general_dilated(
            x, p["w"], window_strides=(1, 1),
            padding=((1, 1), (kernel_sz // 2, kernel_sz // 2)),
            dimension_numbers=("NCHW", "OIHW", "NCHW"),
        ) + p["b"][None, :, None, None]
        x = (x - p["mean"][None, :, None, None]) / jnp.sqrt(
            p["var"][None, :, None, None] + EPS)
        x = x * p["gamma"][None, :, None, None] + p["beta"][None, :, None, None]
        x = jnp.maximum(x, 0.0)
        B, C, H, W = x.shape
        x = jnp.max(x[..., :2 * (W // 2)].reshape(B, C, H, W // 2, 2), axis=-1)
    feat = x.reshape(x.shape[0], -1)
    logits = feat @ params["clf_w"].T + params["clf_b"]
    return jax.nn.log_softmax(logits, axis=-1)


# ----------------------------------------------------------------------------
# Parameter construction (deterministic, synthetic — mirrors __init__ shapes)
# ----------------------------------------------------------------------------
def make_params(key, n_chan, time_step, L, n_classes, kernel_sz):
    # depth_fun == 'default_0': 2**(2+j)
    depths = [int(2 ** (2 + (i + 1))) for i in range(L)]
    depths.append(1)
    depths.reverse()                                  # [1, 8, ..., 2^(L+2)]

    convs = []
    H, W = n_chan, time_step
    for i in range(L):
        cin, cout = depths[i], depths[i + 1]
        key, kw_, kb_, kg_, kbt_, km_, kv_ = jax.random.split(key, 7)
        w = jax.random.normal(kw_, (cout, cin, 3, kernel_sz), jnp.float32) * 0.1
        b = jax.random.normal(kb_, (cout,), jnp.float32) * 0.1
        gamma = jax.random.uniform(kg_, (cout,), jnp.float32, 0.5, 1.5)
        beta = jax.random.normal(kbt_, (cout,), jnp.float32) * 0.1
        mean = jax.random.normal(km_, (cout,), jnp.float32) * 0.1
        var = jax.random.uniform(kv_, (cout,), jnp.float32, 0.5, 1.5)
        convs.append(dict(w=w, b=b, gamma=gamma, beta=beta, mean=mean, var=var))
        W = W // 2                                    # MaxPool(1,2)

    dim = depths[-1] * H * W
    key, kc = jax.random.split(key)
    limit = math.sqrt(6.0 / (dim + n_classes))        # xavier_uniform gain=1
    clf_w = jax.random.uniform(kc, (n_classes, dim), jnp.float32, -limit, limit)
    clf_b = jnp.zeros((n_classes,), jnp.float32)      # init.constant_(bias, 0)
    return dict(convs=convs, clf_w=clf_w, clf_b=clf_b, dim=dim)


# ----------------------------------------------------------------------------
if __name__ == "__main__":
    B, n_chan, time_step = 2, 4, 16
    L, n_classes, kernel_sz = 2, 3, 9

    key = jax.random.PRNGKey(0)
    key, kx = jax.random.split(key)
    x = jax.random.normal(kx, (B, n_chan, time_step), jnp.float32)  # 3-D input path

    params = make_params(key, n_chan, time_step, L, n_classes, kernel_sz)
    pp = prepare_pallas_params(params, n_chan, time_step)            # hoisted, once

    out = jax.block_until_ready(forward_pallas(x, pp))

    ref = jax.block_until_ready(forward_reference(x, params, kernel_sz))
    assert out.shape == (B, n_classes), out.shape
    # bf16 MXU operands => tolerance relaxed vs the f32 reference (review item #1).
    assert jnp.allclose(out, ref, atol=5e-2, rtol=5e-2), (out, ref)

    print("KERNEL_OK")
</pallas_src>

<mosaic_0001>
module attributes {stable_mosaic.version = 11 : i64} {
  func.func @_fused_net_kernel(%arg0: i32, %arg1: memref<8x128xf32, #tpu.memory_space<vmem>>, %arg2: memref<128x1024xbf16, #tpu.memory_space<vmem>>, %arg3: memref<1x1024xf32, #tpu.memory_space<vmem>>, %arg4: memref<512x256xbf16, #tpu.memory_space<vmem>>, %arg5: memref<1x256xf32, #tpu.memory_space<vmem>>, %arg6: memref<128x128xbf16, #tpu.memory_space<vmem>>, %arg7: memref<1x128xf32, #tpu.memory_space<vmem>>, %arg8: memref<8x128xf32, #tpu.memory_space<vmem>>) attributes {dimension_semantics = [#tpu.dimension_semantics<parallel>], iteration_bounds = array<i64: 1>, scalar_prefetch = 0 : i64, scratch_operands = 0 : i64, tpu.core_type = #tpu.core_type<tc>, window_params = [{transform_indices = @transform_0, window_bounds = array<i64: 8, 128>}, {pipeline_mode = #tpu.pipeline_mode<synchronous>, transform_indices = @transform_1, window_bounds = array<i64: 128, 1024>}, {pipeline_mode = #tpu.pipeline_mode<synchronous>, transform_indices = @transform_2, window_bounds = array<i64: 1, 1024>}, {pipeline_mode = #tpu.pipeline_mode<synchronous>, transform_indices = @transform_3, window_bounds = array<i64: 512, 256>}, {pipeline_mode = #tpu.pipeline_mode<synchronous>, transform_indices = @transform_4, window_bounds = array<i64: 1, 256>}, {pipeline_mode = #tpu.pipeline_mode<synchronous>, transform_indices = @transform_5, window_bounds = array<i64: 128, 128>}, {pipeline_mode = #tpu.pipeline_mode<synchronous>, transform_indices = @transform_6, window_bounds = array<i64: 1, 128>}, {transform_indices = @transform_7, window_bounds = array<i64: 8, 128>}]} {
    %c0 = arith.constant 0 : index
    %c0_0 = arith.constant 0 : index
    %0 = vector.load %arg1[%c0, %c0_0] : memref<8x128xf32, #tpu.memory_space<vmem>>, vector<8x128xf32>
    %c0_1 = arith.constant 0 : index
    %c0_2 = arith.constant 0 : index
    %1 = vector.load %arg2[%c0_1, %c0_2] : memref<128x1024xbf16, #tpu.memory_space<vmem>>, vector<128x1024xbf16>
    %c0_3 = arith.constant 0 : index
    %c0_4 = arith.constant 0 : index
    %2 = vector.load %arg3[%c0_3, %c0_4] : memref<1x1024xf32, #tpu.memory_space<vmem>>, vector<1x1024xf32>
    %3 = arith.truncf %0 : vector<8x128xf32> to vector<8x128xbf16>
    %cst = arith.constant dense<0.000000e+00> : vector<8x1024xf32>
    %4 = tpu.matmul %3, %1, %cst {dimension_numbers = #tpu.dot_dimension_numbers<[1], [0], [0], [1], [0, 0, 1, 1], [], []>} : vector<8x128xbf16>, vector<128x1024xbf16>, vector<8x1024xf32> -> vector<8x1024xf32>
    %5 = vector.broadcast %2 : vector<1x1024xf32> to vector<8x1024xf32>
    %6 = arith.addf %4, %5 : vector<8x1024xf32>
    %cst_5 = arith.constant 0.000000e+00 : f32
    %7 = vector.broadcast %cst_5 : f32 to vector<8x1024xf32>
    %8 = arith.maximumf %6, %7 : vector<8x1024xf32>
    %9 = vector.extract_strided_slice %8 {offsets = [0, 0], sizes = [8, 512], strides = [1, 1]} : vector<8x1024xf32> to vector<8x512xf32>
    %10 = vector.extract_strided_slice %8 {offsets = [0, 512], sizes = [8, 512], strides = [1, 1]} : vector<8x1024xf32> to vector<8x512xf32>
    %11 = arith.maximumf %9, %10 : vector<8x512xf32>
    %c0_6 = arith.constant 0 : index
    %c0_7 = arith.constant 0 : index
    %12 = vector.load %arg4[%c0_6, %c0_7] : memref<512x256xbf16, #tpu.memory_space<vmem>>, vector<512x256xbf16>
    %c0_8 = arith.constant 0 : index
    %c0_9 = arith.constant 0 : index
    %13 = vector.load %arg5[%c0_8, %c0_9] : memref<1x256xf32, #tpu.memory_space<vmem>>, vector<1x256xf32>
    %14 = arith.truncf %11 : vector<8x512xf32> to vector<8x512xbf16>
    %cst_10 = arith.constant dense<0.000000e+00> : vector<8x256xf32>
    %15 = tpu.matmul %14, %12, %cst_10 {dimension_numbers = #tpu.dot_dimension_numbers<[1], [0], [0], [1], [0, 0, 1, 1], [], []>} : vector<8x512xbf16>, vector<512x256xbf16>, vector<8x256xf32> -> vector<8x256xf32>
    %16 = vector.broadcast %13 : vector<1x256xf32> to vector<8x256xf32>
    %17 = arith.addf %15, %16 : vector<8x256xf32>
    %cst_11 = arith.constant 0.000000e+00 : f32
    %18 = vector.broadcast %cst_11 : f32 to vector<8x256xf32>
    %19 = arith.maximumf %17, %18 : vector<8x256xf32>
    %20 = vector.extract_strided_slice %19 {offsets = [0, 0], sizes = [8, 128], strides = [1, 1]} : vector<8x256xf32> to vector<8x128xf32>
    %21 = vector.extract_strided_slice %19 {offsets = [0, 128], sizes = [8, 128], strides = [1, 1]} : vector<8x256xf32> to vector<8x128xf32>
    %22 = arith.maximumf %20, %21 : vector<8x128xf32>
    %c0_12 = arith.constant 0 : index
    %c0_13 = arith.constant 0 : index
    %23 = vector.load %arg6[%c0_12, %c0_13] : memref<128x128xbf16, #tpu.memory_space<vmem>>, vector<128x128xbf16>
    %c0_14 = arith.constant 0 : index
    %c0_15 = arith.constant 0 : index
    %24 = vector.load %arg7[%c0_14, %c0_15] : memref<1x128xf32, #tpu.memory_space<vmem>>, vector<1x128xf32>
    %25 = arith.truncf %22 : vector<8x128xf32> to vector<8x128xbf16>
    %cst_16 = arith.constant dense<0.000000e+00> : vector<8x128xf32>
    %26 = tpu.matmul %25, %23, %cst_16 {dimension_numbers = #tpu.dot_dimension_numbers<[1], [0], [0], [1], [0, 0, 1, 1], [], []>} : vector<8x128xbf16>, vector<128x128xbf16>, vector<8x128xf32> -> vector<8x128xf32>
    %27 = vector.broadcast %24 : vector<1x128xf32> to vector<8x128xf32>
    %28 = arith.addf %26, %27 : vector<8x128xf32>
    %cst_17 = arith.constant dense<0xFF800000> : vector<8xf32>
    %29 = vector.multi_reduction <maximumf>, %28, %cst_17 [1] : vector<8x128xf32> to vector<8xf32>
    %30 = vector.shape_cast %29 : vector<8xf32> to vector<8x1xf32>
    %31 = vector.broadcast %30 : vector<8x1xf32> to vector<8x128xf32>
    %32 = arith.subf %28, %31 : vector<8x128xf32>
    %33 = math.exp %32 : vector<8x128xf32>
    %cst_18 = arith.constant dense<0.000000e+00> : vector<8xf32>
    %34 = vector.multi_reduction <add>, %33, %cst_18 [1] : vector<8x128xf32> to vector<8xf32>
    %35 = vector.shape_cast %34 : vector<8xf32> to vector<8x1xf32>
    %36 = math.log %35 : vector<8x1xf32>
    %37 = vector.broadcast %36 : vector<8x1xf32> to vector<8x128xf32>
    %38 = arith.subf %32, %37 : vector<8x128xf32>
    %c0_19 = arith.constant 0 : index
    %c0_20 = arith.constant 0 : index
    %39 = vector.load %arg8[%c0_19, %c0_20] : memref<8x128xf32, #tpu.memory_space<vmem>>, vector<8x128xf32>
    tpu.vector_store %arg8[%c0_19, %c0_20], %38 {strides = array<i32>} : memref<8x128xf32, #tpu.memory_space<vmem>>, vector<8x128xf32>,
    return
  }
  func.func @transform_0(%arg0: i32) -> (i32, i32) {
    %c0_i32 = arith.constant 0 : i32
    %c0_i32_0 = arith.constant 0 : i32
    return %arg0, %c0_i32 : i32, i32
  }
  func.func @transform_1(%arg0: i32) -> (i32, i32) {
    %c0_i32 = arith.constant 0 : i32
    %c0_i32_0 = arith.constant 0 : i32
    %c0_i32_1 = arith.constant 0 : i32
    return %c0_i32, %c0_i32_0 : i32, i32
  }
  func.func @transform_2(%arg0: i32) -> (i32, i32) {
    %c0_i32 = arith.constant 0 : i32
    %c0_i32_0 = arith.constant 0 : i32
    %c0_i32_1 = arith.constant 0 : i32
    return %c0_i32, %c0_i32_0 : i32, i32
  }
  func.func @transform_3(%arg0: i32) -> (i32, i32) {
    %c0_i32 = arith.constant 0 : i32
    %c0_i32_0 = arith.constant 0 : i32
    %c0_i32_1 = arith.constant 0 : i32
    return %c0_i32, %c0_i32_0 : i32, i32
  }
  func.func @transform_4(%arg0: i32) -> (i32, i32) {
    %c0_i32 = arith.constant 0 : i32
    %c0_i32_0 = arith.constant 0 : i32
    %c0_i32_1 = arith.constant 0 : i32
    return %c0_i32, %c0_i32_0 : i32, i32
  }
  func.func @transform_5(%arg0: i32) -> (i32, i32) {
    %c0_i32 = arith.constant 0 : i32
    %c0_i32_0 = arith.constant 0 : i32
    %c0_i32_1 = arith.constant 0 : i32
    return %c0_i32, %c0_i32_0 : i32, i32
  }
  func.func @transform_6(%arg0: i32) -> (i32, i32) {
    %c0_i32 = arith.constant 0 : i32
    %c0_i32_0 = arith.constant 0 : i32
    %c0_i32_1 = arith.constant 0 : i32
    return %c0_i32, %c0_i32_0 : i32, i32
  }
  func.func @transform_7(%arg0: i32) -> (i32, i32) {
    %c0_i32 = arith.constant 0 : i32
    %c0_i32_0 = arith.constant 0 : i32
    return %arg0, %c0_i32 : i32, i32
  }
}

module attributes {stable_mosaic.version = 11 : i64} {
  func.func @_fused_net_kernel(%arg0: i32, %arg1: memref<8x128xf32, #tpu.memory_space<vmem>>, %arg2: memref<128x1024xbf16, #tpu.memory_space<vmem>>, %arg3: memref<1x1024xf32, #tpu.memory_space<vmem>>, %arg4: memref<512x256xbf16, #tpu.memory_space<vmem>>, %arg5: memref<1x256xf32, #tpu.memory_space<vmem>>, %arg6: memref<128x128xbf16, #tpu.memory_space<vmem>>, %arg7: memref<1x128xf32, #tpu.memory_space<vmem>>, %arg8: memref<8x128xf32, #tpu.memory_space<vmem>>) attributes {dimension_semantics = [#tpu.dimension_semantics<parallel>], iteration_bounds = array<i64: 1>, scalar_prefetch = 0 : i64, scratch_operands = 0 : i64, tpu.core_type = #tpu.core_type<tc>, window_params = [{transform_indices = @transform_0, window_bounds = array<i64: 8, 128>}, {pipeline_mode = #tpu.pipeline_mode<synchronous>, transform_indices = @transform_1, window_bounds = array<i64: 128, 1024>}, {pipeline_mode = #tpu.pipeline_mode<synchronous>, transform_indices = @transform_2, window_bounds = array<i64: 1, 1024>}, {pipeline_mode = #tpu.pipeline_mode<synchronous>, transform_indices = @transform_3, window_bounds = array<i64: 512, 256>}, {pipeline_mode = #tpu.pipeline_mode<synchronous>, transform_indices = @transform_4, window_bounds = array<i64: 1, 256>}, {pipeline_mode = #tpu.pipeline_mode<synchronous>, transform_indices = @transform_5, window_bounds = array<i64: 128, 128>}, {pipeline_mode = #tpu.pipeline_mode<synchronous>, transform_indices = @transform_6, window_bounds = array<i64: 1, 128>}, {transform_indices = @transform_7, window_bounds = array<i64: 8, 128>}]} {
    %c0 = arith.constant 0 : index
    %c0_0 = arith.constant 0 : index
    %0 = vector.load %arg1[%c0, %c0_0] : memref<8x128xf32, #tpu.memory_space<vmem>>, vector<8x128xf32>
    %c0_1 = arith.constant 0 : index
    %c0_2 = arith.constant 0 : index
    %1 = vector.load %arg2[%c0_1, %c0_2] : memref<128x1024xbf16, #tpu.memory_space<vmem>>, vector<128x1024xbf16>
    %c0_3 = arith.constant 0 : index
    %c0_4 = arith.constant 0 : index
    %2 = vector.load %arg3[%c0_3, %c0_4] : memref<1x1024xf32, #tpu.memory_space<vmem>>, vector<1x1024xf32>
    %3 = arith.truncf %0 : vector<8x128xf32> to vector<8x128xbf16>
    %cst = arith.constant dense<0.000000e+00> : vector<8x1024xf32>
    %4 = tpu.matmul %3, %1, %cst {dimension_numbers = #tpu.dot_dimension_numbers<[1], [0], [0], [1], [0, 0, 1, 1], [], []>} : vector<8x128xbf16>, vector<128x1024xbf16>, vector<8x1024xf32> -> vector<8x1024xf32>
    %5 = vector.broadcast %2 : vector<1x1024xf32> to vector<8x1024xf32>
    %6 = arith.addf %4, %5 : vector<8x1024xf32>
    %cst_5 = arith.constant 0.000000e+00 : f32
    %7 = vector.broadcast %cst_5 : f32 to vector<8x1024xf32>
    %8 = arith.maximumf %6, %7 : vector<8x1024xf32>
    %9 = vector.extract_strided_slice %8 {offsets = [0, 0], sizes = [8, 512], strides = [1, 1]} : vector<8x1024xf32> to vector<8x512xf32>
    %10 = vector.extract_strided_slice %8 {offsets = [0, 512], sizes = [8, 512], strides = [1, 1]} : vector<8x1024xf32> to vector<8x512xf32>
    %11 = arith.maximumf %9, %10 : vector<8x512xf32>
    %c0_6 = arith.constant 0 : index
    %c0_7 = arith.constant 0 : index
    %12 = vector.load %arg4[%c0_6, %c0_7] : memref<512x256xbf16, #tpu.memory_space<vmem>>, vector<512x256xbf16>
    %c0_8 = arith.constant 0 : index
    %c0_9 = arith.constant 0 : index
    %13 = vector.load %arg5[%c0_8, %c0_9] : memref<1x256xf32, #tpu.memory_space<vmem>>, vector<1x256xf32>
    %14 = arith.truncf %11 : vector<8x512xf32> to vector<8x512xbf16>
    %cst_10 = arith.constant dense<0.000000e+00> : vector<8x256xf32>
    %15 = tpu.matmul %14, %12, %cst_10 {dimension_numbers = #tpu.dot_dimension_numbers<[1], [0], [0], [1], [0, 0, 1, 1], [], []>} : vector<8x512xbf16>, vector<512x256xbf16>, vector<8x256xf32> -> vector<8x256xf32>
    %16 = vector.broadcast %13 : vector<1x256xf32> to vector<8x256xf32>
    %17 = arith.addf %15, %16 : vector<8x256xf32>
    %cst_11 = arith.constant 0.000000e+00 : f32
    %18 = vector.broadcast %cst_11 : f32 to vector<8x256xf32>
    %19 = arith.maximumf %17, %18 : vector<8x256xf32>
    %20 = vector.extract_strided_slice %19 {offsets = [0, 0], sizes = [8, 128], strides = [1, 1]} : vector<8x256xf32> to vector<8x128xf32>
    %21 = vector.extract_strided_slice %19 {offsets = [0, 128], sizes = [8, 128], strides = [1, 1]} : vector<8x256xf32> to vector<8x128xf32>
    %22 = arith.maximumf %20, %21 : vector<8x128xf32>
    %c0_12 = arith.constant 0 : index
    %c0_13 = arith.constant 0 : index
    %23 = vector.load %arg6[%c0_12, %c0_13] : memref<128x128xbf16, #tpu.memory_space<vmem>>, vector<128x128xbf16>
    %c0_14 = arith.constant 0 : index
    %c0_15 = arith.constant 0 : index
    %24 = vector.load %arg7[%c0_14, %c0_15] : memref<1x128xf32, #tpu.memory_space<vmem>>, vector<1x128xf32>
    %25 = arith.truncf %22 : vector<8x128xf32> to vector<8x128xbf16>
    %cst_16 = arith.constant dense<0.000000e+00> : vector<8x128xf32>
    %26 = tpu.matmul %25, %23, %cst_16 {dimension_numbers = #tpu.dot_dimension_numbers<[1], [0], [0], [1], [0, 0, 1, 1], [], []>} : vector<8x128xbf16>, vector<128x128xbf16>, vector<8x128xf32> -> vector<8x128xf32>
    %27 = vector.broadcast %24 : vector<1x128xf32> to vector<8x128xf32>
    %28 = arith.addf %26, %27 : vector<8x128xf32>
    %cst_17 = arith.constant dense<0xFF800000> : vector<8xf32>
    %29 = vector.multi_reduction <maximumf>, %28, %cst_17 [1] : vector<8x128xf32> to vector<8xf32>
    %30 = vector.shape_cast %29 : vector<8xf32> to vector<8x1xf32>
    %31 = vector.broadcast %30 : vector<8x1xf32> to vector<8x128xf32>
    %32 = arith.subf %28, %31 : vector<8x128xf32>
    %33 = math.exp %32 : vector<8x128xf32>
    %cst_18 = arith.constant dense<0.000000e+00> : vector<8xf32>
    %34 = vector.multi_reduction <add>, %33, %cst_18 [1] : vector<8x128xf32> to vector<8xf32>
    %35 = vector.shape_cast %34 : vector<8xf32> to vector<8x1xf32>
    %36 = math.log %35 : vector<8x1xf32>
    %37 = vector.broadcast %36 : vector<8x1xf32> to vector<8x128xf32>
    %38 = arith.subf %32, %37 : vector<8x128xf32>
    %c0_19 = arith.constant 0 : index
    %c0_20 = arith.constant 0 : index
    %39 = vector.load %arg8[%c0_19, %c0_20] : memref<8x128xf32, #tpu.memory_space<vmem>>, vector<8x128xf32>
    tpu.vector_store %arg8[%c0_19, %c0_20], %38 {strides = array<i32>} : memref<8x128xf32, #tpu.memory_space<vmem>>, vector<8x128xf32>,
    return
  }
  func.func @transform_0(%arg0: i32) -> (i32, i32) {
    %c0_i32 = arith.constant 0 : i32
    %c0_i32_0 = arith.constant 0 : i32
    return %arg0, %c0_i32 : i32, i32
  }
  func.func @transform_1(%arg0: i32) -> (i32, i32) {
    %c0_i32 = arith.constant 0 : i32
    %c0_i32_0 = arith.constant 0 : i32
    %c0_i32_1 = arith.constant 0 : i32
    return %c0_i32, %c0_i32_0 : i32, i32
  }
  func.func @transform_2(%arg0: i32) -> (i32, i32) {
    %c0_i32 = arith.constant 0 : i32
    %c0_i32_0 = arith.constant 0 : i32
    %c0_i32_1 = arith.constant 0 : i32
    return %c0_i32, %c0_i32_0 : i32, i32
  }
  func.func @transform_3(%arg0: i32) -> (i32, i32) {
    %c0_i32 = arith.constant 0 : i32
    %c0_i32_0 = arith.constant 0 : i32
    %c0_i32_1 = arith.constant 0 : i32
    return %c0_i32, %c0_i32_0 : i32, i32
  }
  func.func @transform_4(%arg0: i32) -> (i32, i32) {
    %c0_i32 = arith.constant 0 : i32
    %c0_i32_0 = arith.constant 0 : i32
    %c0_i32_1 = arith.constant 0 : i32
    return %c0_i32, %c0_i32_0 : i32, i32
  }
  func.func @transform_5(%arg0: i32) -> (i32, i32) {
    %c0_i32 = arith.constant 0 : i32
    %c0_i32_0 = arith.constant 0 : i32
    %c0_i32_1 = arith.constant 0 : i32
    return %c0_i32, %c0_i32_0 : i32, i32
  }
  func.func @transform_6(%arg0: i32) -> (i32, i32) {
    %c0_i32 = arith.constant 0 : i32
    %c0_i32_0 = arith.constant 0 : i32
    %c0_i32_1 = arith.constant 0 : i32
    return %c0_i32, %c0_i32_0 : i32, i32
  }
  func.func @transform_7(%arg0: i32) -> (i32, i32) {
    %c0_i32 = arith.constant 0 : i32
    %c0_i32_0 = arith.constant 0 : i32
    return %arg0, %c0_i32 : i32, i32
  }
}

</mosaic_0001>

<bundles_post_ra>
// kernel: tpu_custom_call.1
= control target key start
LH: loop header
LB: loop body
LE: loop exit
PB: predicated region body
PF: predicated region fallthrough
CT: control target
= control target key end

     0   :  { %12 = vsyncpa [#allocation3], 0  ;;  %s1936_s0 = inlined_call_operand.hbm [shape: f32[8,128], index: 0, kind: input, shape index: {}]   ;;  %s1937_s1 = inlined_call_operand.hbm [shape: bf16[128,1024], index: 1, kind: input, shape index: {}]   ;;  %s1938_s2 = inlined_call_operand.hbm [shape: f32[1,1024], index: 2, kind: input, shape index: {}]   ;;  %s1939_s3 = inlined_call_operand.hbm [shape: bf16[512,256], index: 3, kind: input, shape index: {}]   ;;  %s1940_s4 = inlined_call_operand.vmem [shape: f32[1,256], index: 4, kind: input, shape index: {}]   ;;  %s1941_s5 = inlined_call_operand.hbm [shape: bf16[128,128], index: 5, kind: input, shape index: {}]   ;;  %s1942_s6 = inlined_call_operand.vmem [shape: f32[1,128], index: 6, kind: input, shape index: {}]   ;;  %s1943_s7 = inlined_call_operand.hbm [shape: f32[8,128], index: 7, kind: output, shape index: {}]  }
   0x1   :  { %13 = vsyncpa [#allocation6], 0 }
   0x2   :  { %14 = vsyncpa [#allocation9], 0 }
   0x3   :  { %15 = vsyncpa [#allocation4], 0  ;;  %s1756_s24 = smov [#allocation5]   ;;  %s1616_s28 = scalar_lea.hbm %s1937_s1, 8192 }
   0x4   :  { %s31_s25 = sshll.u32 %s1756_s24, 4  ;;  %p1617_p0 = scmp.ne.s32.totalorder %s1937_s1, %s1616_s28  ;;  %s32_s25 = int_to_ptr.vmem [resolvable:$true] %s31_s25 }
   0x5   :  { %p1620_p1 = scmp.lt.u32.totalorder %s1616_s28, %s1937_s1 }
   0x7   :  { %p1622_p2 = pnand %p1620_p1, %p1617_p0 }
   0x9   :  { %1625 = shalt.err (!%p1622_p2)
}
   0xa   :  { %s1626_s10 = scalar_lea.vmem %s32_s25, 8192  ;;  %p1631_p4 = scmp.lt.s32.totalorder %s32_s25, %s32_s25 }
   0xb   :  { %p1627_p3 = scmp.ne.s32.totalorder %s32_s25, %s1626_s10  ;;  %p1632_p5 = scmp.lt.s32.totalorder %s1626_s10, %s1626_s10 }
   0xd   :  { %p1633_p6 = por %p1632_p5, %p1631_p4 }
   0xf   :  { %p1634_p7 = pnand %p1633_p6, %p1627_p3 }
  0x11   :  { %1637 = shalt.err (!%p1634_p7)
}
  0x12   :  { %s1757_s11 = smov 512   ;;  %s1758_s12 = smov 32  }
  0x13   :  { %37 = dma.hbm_to_vmem [thread:$0]  %s1937_s1, 8192, %s32_s25, [#allocation6], %s1757_s11, %s1757_s11, %s1758_s12  }
  0x14   :  { %s1759_s15 = smov [#allocation8]   ;;  %s1638_s19 = scalar_lea.hbm %s1939_s3, 8192 }
  0x15   :  { %s53_s16 = sshll.u32 %s1759_s15, 4  ;;  %p1639_p8 = scmp.ne.s32.totalorder %s1939_s3, %s1638_s19  ;;  %s54_s16 = int_to_ptr.vmem [resolvable:$true] %s53_s16 }
  0x16   :  { %p1642_p9 = scmp.lt.u32.totalorder %s1638_s19, %s1939_s3 }
  0x18   :  { %p1644_p10 = pnand %p1642_p9, %p1639_p8 }
  0x1a   :  { %1647 = shalt.err (!%p1644_p10)
}
  0x1b   :  { %s1648_s24 = scalar_lea.vmem %s54_s16, 8192  ;;  %p1653_p12 = scmp.lt.s32.totalorder %s54_s16, %s54_s16 }
  0x1c   :  { %p1649_p11 = scmp.ne.s32.totalorder %s54_s16, %s1648_s24  ;;  %p1654_p13 = scmp.lt.s32.totalorder %s1648_s24, %s1648_s24 }
  0x1e   :  { %p1655_p0 = por %p1654_p13, %p1653_p12 }
  0x20   :  { %p1656_p1 = pnand %p1655_p0, %p1649_p11 }
  0x22   :  { %1659 = shalt.err (!%p1656_p1)
}
  0x23   :  { %s1760_s1 = smov 128   ;;  %s1761_s25 = smov 8  }
  0x24   :  { %59 = dma.hbm_to_vmem [thread:$0]  %s1939_s3, 8192, %s54_s16, [#allocation9], %s1760_s1, %s1760_s1, %s1761_s25  }
  0x25   :  { %s1762_s28 = smov [#allocation2]   ;;  %s1763_s30 = smov [#allocation7]  }
  0x26   :  { %s22_s29 = sshll.u32 %s1762_s28, 4  ;;  %s44_s8 = sshll.u32 %s1763_s30, 4  ;;  %s23_s29 = int_to_ptr.vmem [resolvable:$true] %s22_s29  ;;  %s45_s8 = int_to_ptr.vmem [resolvable:$true] %s44_s8 }
  0x27   :  { %s1660_s11 = scalar_lea.hbm %s1936_s0, 128 }
  0x28   :  { %p1661_p2 = scmp.ne.s32.totalorder %s1936_s0, %s1660_s11  ;;  %p1664_p3 = scmp.lt.u32.totalorder %s1660_s11, %s1936_s0 }
  0x2a   :  { %p1666_p4 = pnand %p1664_p3, %p1661_p2 }
  0x2c   :  { %1669 = shalt.err (!%p1666_p4)
}
  0x2d   :  { %s1670_s3 = scalar_lea.vmem %s23_s29, 128  ;;  %p1675_p6 = scmp.lt.s32.totalorder %s23_s29, %s23_s29 }
  0x2e   :  { %p1671_p5 = scmp.ne.s32.totalorder %s23_s29, %s1670_s3  ;;  %p1676_p7 = scmp.lt.s32.totalorder %s1670_s3, %s1670_s3 }
  0x30   :  { %p1677_p8 = por %p1676_p7, %p1675_p6 }
  0x32   :  { %p1678_p9 = pnand %p1677_p8, %p1671_p5 }
  0x34   :  { %1681 = shalt.err (!%p1678_p9)
}
  0x35   :  { %25 = dma.hbm_to_vmem [thread:$0]  %s1936_s0, 128, %s23_s29, [#allocation3]  }
  0x36   :  { %s1682_s20 = scalar_lea.hbm %s1938_s2, 128 }
  0x37   :  { %p1683_p10 = scmp.ne.s32.totalorder %s1938_s2, %s1682_s20  ;;  %p1686_p11 = scmp.lt.u32.totalorder %s1682_s20, %s1938_s2 }
  0x39   :  { %p1688_p12 = pnand %p1686_p11, %p1683_p10 }
  0x3b   :  { %1691 = shalt.err (!%p1688_p12)
}
  0x3c   :  { %s1692_s1 = scalar_lea.vmem %s45_s8, 128  ;;  %p1697_p0 = scmp.lt.s32.totalorder %s45_s8, %s45_s8 }
  0x3d   :  { %p1693_p13 = scmp.ne.s32.totalorder %s45_s8, %s1692_s1  ;;  %p1698_p1 = scmp.lt.s32.totalorder %s1692_s1, %s1692_s1 }
  0x3f   :  { %p1699_p2 = por %p1698_p1, %p1697_p0 }
  0x41   :  { %p1700_p3 = pnand %p1699_p2, %p1693_p13 }
  0x43   :  { %1703 = shalt.err (!%p1700_p3)
}
  0x44   :  { %47 = dma.hbm_to_vmem [thread:$0]  %s1938_s2, 128, %s45_s8, [#allocation6]  }
  0x45   :  { %s1764_s26 = smov [#allocation10]   ;;  %s1704_s30 = scalar_lea.hbm %s1941_s5, 1024 }
  0x46   :  { %s67_s27 = sshll.u32 %s1764_s26, 4  ;;  %p1705_p4 = scmp.ne.s32.totalorder %s1941_s5, %s1704_s30  ;;  %s68_s27 = int_to_ptr.vmem [resolvable:$true] %s67_s27 }
  0x47   :  { %p1708_p5 = scmp.lt.u32.totalorder %s1704_s30, %s1941_s5 }
  0x49   :  { %p1710_p6 = pnand %p1708_p5, %p1705_p4 }
  0x4b   :  { %1713 = shalt.err (!%p1710_p6)
}
  0x4c   :  { %s1714_s13 = scalar_lea.vmem %s68_s27, 1024  ;;  %p1719_p8 = scmp.lt.s32.totalorder %s68_s27, %s68_s27 }
  0x4d   :  { %p1715_p7 = scmp.ne.s32.totalorder %s68_s27, %s1714_s13  ;;  %p1720_p9 = scmp.lt.s32.totalorder %s1714_s13, %s1714_s13 }
  0x4f   :  { %p1721_p10 = por %p1720_p9, %p1719_p8 }
  0x51   :  { %p1722_p11 = pnand %p1721_p10, %p1715_p7 }
  0x53   :  { %1725 = shalt.err (!%p1722_p11)
}
  0x54   :  { %s1765_s2 = smov 64   ;;  %s1766_s8 = smov 4  }
  0x55   :  { %73 = dma.hbm_to_vmem [thread:$0]  %s1941_s5, 1024, %s68_s27, [#allocation9], %s1765_s2, %s1765_s2, %s1766_s8  }
  0x56   :  { %1748 = dma.done.wait [#allocation3], 128  }
  0x57   :  { %1749 = vsyncadd [#allocation3], 4294967168 }
  0x58   :  { %1750 = dma.done.wait [#allocation6], 8320  }
  0x59   :  { %1751 = vsyncadd [#allocation6], 4294958976 }
  0x5a   :  { %1752 = dma.done.wait [#allocation9], 9216  }
  0x5b   :  { %1753 = vsyncadd [#allocation9], 4294958080  ;;  %v1767_v0 = vmov 0   ;;  %v93_v1 = vld [vmem:[#allocation5] sm:$0xff]  ;;  %v95_v3 = vld [vmem:[#allocation5 + $0x10] sm:$0xff]  ;;  %vm1769_vm0 = vmmov 0  }
  0x5c   :  { %552 = vmatprep.mubr.bf16.mxu1 %v1767_v0  ;;  %634 = vmatprep.mubr.bf16.mxu0 %v1767_v0  ;;  %v97_v2 = vld [vmem:[#allocation5 + $0x20] sm:$0xff]  ;;  %v99_v5 = vld [vmem:[#allocation5 + $0x30] sm:$0xff]  ;;  %v94_v63 = vld [vmem:[#allocation5 + $0x8] sm:$0xff] }
  0x5d   :  { %v1322_v4 = vcombine.high %v93_v1, %v97_v2  ;;  %v1321_v6 = vcombine.low %v93_v1, %v97_v2  ;;  %v101_v7 = vld [vmem:[#allocation5 + $0x40] sm:$0xff]  ;;  %v1326_v9 = vcombine.high %v95_v3, %v99_v5  ;;  %v1325_v10 = vcombine.low %v95_v3, %v99_v5  ;;  %v103_v12 = vld [vmem:[#allocation5 + $0x50] sm:$0xff]  ;;  %v98_v1 = vld [vmem:[#allocation5 + $0x28] sm:$0xff] }
  0x5e   :  { %v105_v8 = vld [vmem:[#allocation5 + $0x60] sm:$0xff]  ;;  %v107_v13 = vld [vmem:[#allocation5 + $0x70] sm:$0xff]  ;;  %v92_v3 = vld [vmem:[#allocation2] sm:$0xff]  ;;  %v1324_v5 = vcombine.high %v94_v63, %v98_v1 }
  0x5f   :  { %v1330_v11 = vcombine.high %v101_v7, %v105_v8  ;;  %v109_v14 = vld [vmem:[#allocation5 + $0x80] sm:$0xff]  ;;  %520 = vmatprep.subr.bf16.mxu1 %v1322_v4  ;;  %v1334_v15 = vcombine.high %v103_v12, %v107_v13  ;;  %v111_v17 = vld [vmem:[#allocation5 + $0x90] sm:$0xff]  ;;  %602 = vmatprep.subr.bf16.mxu0 %v1326_v9  ;;  %v1329_v19 = vcombine.low %v101_v7, %v105_v8  ;;  %v106_v7 = vld [vmem:[#allocation5 + $0x68] sm:$0xff] }
  0x60   :  { %v113_v16 = vld [vmem:[#allocation5 + $0xa0] sm:$0xff]  ;;  %v115_v18 = vld [vmem:[#allocation5 + $0xb0] sm:$0xff]  ;;  %521 = vmatpush1.bf16.msra.mxu1 %v1321_v6  ;;  %603 = vmatpush1.bf16.msra.mxu0 %v1325_v10  ;;  %v1333_v20 = vcombine.low %v103_v12, %v107_v13  ;;  %v102_v6 = vld [vmem:[#allocation5 + $0x48] sm:$0xff]  ;;  %v1873_v9 = vpack.c.bf16 %v92_v3, %v92_v3  ;;  %v1323_v10 = vcombine.low %v94_v63, %v98_v1 }
  0x61   :  { %522 = vmatprep.subr.bf16.mxu1 %v1330_v11  ;;  %v1338_v21 = vcombine.high %v109_v14, %v113_v16  ;;  %604 = vmatprep.subr.bf16.mxu0 %v1334_v15  ;;  %v1342_v22 = vcombine.high %v111_v17, %v115_v18  ;;  %v117_v23 = vld [vmem:[#allocation5 + $0xc0] sm:$0xff]  ;;  %v119_v25 = vld [vmem:[#allocation5 + $0xd0] sm:$0xff]  ;;  %v1337_v27 = vcombine.low %v109_v14, %v113_v16  ;;  %v110_v12 = vld [vmem:[#allocation5 + $0x88] sm:$0xff] }
  0x62   :  { %v121_v24 = vld [vmem:[#allocation5 + $0xe0] sm:$0xff]  ;;  %v123_v26 = vld [vmem:[#allocation5 + $0xf0] sm:$0xff]  ;;  %v1341_v28 = vcombine.low %v111_v17, %v115_v18  ;;  %v1332_v11 = vcombine.high %v102_v6, %v106_v7  ;;  %v114_v13 = vld [vmem:[#allocation5 + $0xa8] sm:$0xff]  ;;  %v1331_v16 = vcombine.low %v102_v6, %v106_v7 }
  0x63   :  { %v1346_v29 = vcombine.high %v117_v23, %v121_v24  ;;  %v1350_v30 = vcombine.high %v119_v25, %v123_v26  ;;  %v125_v31 = vld [vmem:[#allocation5 + $0x100] sm:$0xff]  ;;  %v127_v33 = vld [vmem:[#allocation5 + $0x110] sm:$0xff]  ;;  %v1345_v35 = vcombine.low %v117_v23, %v121_v24  ;;  %v1349_v36 = vcombine.low %v119_v25, %v123_v26  ;;  %v118_v18 = vld [vmem:[#allocation5 + $0xc8] sm:$0xff] }
  0x64   :  { %523 = vmatpush1.bf16.msra.mxu1 %v1329_v19  ;;  %605 = vmatpush1.bf16.msra.mxu0 %v1333_v20  ;;  %v129_v32 = vld [vmem:[#allocation5 + $0x120] sm:$0xff]  ;;  %v131_v34 = vld [vmem:[#allocation5 + $0x130] sm:$0xff]  ;;  %v1340_v17 = vcombine.high %v110_v12, %v114_v13  ;;  %v122_v19 = vld [vmem:[#allocation5 + $0xe8] sm:$0xff] }
  0x65   :  { %524 = vmatprep.subr.bf16.mxu1 %v1338_v21  ;;  %606 = vmatprep.subr.bf16.mxu0 %v1342_v22  ;;  %v1354_v37 = vcombine.high %v125_v31, %v129_v32  ;;  %v1358_v38 = vcombine.high %v127_v33, %v131_v34  ;;  %v133_v39 = vld [vmem:[#allocation5 + $0x140] sm:$0xff]  ;;  %v135_v41 = vld [vmem:[#allocation5 + $0x150] sm:$0xff]  ;;  %v1353_v43 = vcombine.low %v125_v31, %v129_v32  ;;  %v126_v23 = vld [vmem:[#allocation5 + $0x108] sm:$0xff] }
  0x66   :  { %v137_v40 = vld [vmem:[#allocation5 + $0x160] sm:$0xff]  ;;  %v139_v42 = vld [vmem:[#allocation5 + $0x170] sm:$0xff]  ;;  %v1357_v44 = vcombine.low %v127_v33, %v131_v34  ;;  %v1339_v22 = vcombine.low %v110_v12, %v114_v13  ;;  %v130_v24 = vld [vmem:[#allocation5 + $0x128] sm:$0xff]  ;;  %v1348_v26 = vcombine.high %v118_v18, %v122_v19 }
  0x67   :  { %v1362_v45 = vcombine.high %v133_v39, %v137_v40  ;;  %v1366_v46 = vcombine.high %v135_v41, %v139_v42  ;;  %v141_v47 = vld [vmem:[#allocation5 + $0x180] sm:$0xff]  ;;  %v143_v49 = vld [vmem:[#allocation5 + $0x190] sm:$0xff]  ;;  %v1361_v51 = vcombine.low %v133_v39, %v137_v40  ;;  %v1365_v52 = vcombine.low %v135_v41, %v139_v42  ;;  %v150_v41 = vld [vmem:[#allocation5 + $0x1c8] sm:$0xff] }
  0x68   :  { %525 = vmatpush1.bf16.msra.mxu1 %v1337_v27  ;;  %607 = vmatpush1.bf16.msra.mxu0 %v1341_v28  ;;  %v145_v48 = vld [vmem:[#allocation5 + $0x1a0] sm:$0xff]  ;;  %v147_v50 = vld [vmem:[#allocation5 + $0x1b0] sm:$0xff]  ;;  %v1347_v28 = vcombine.low %v118_v18, %v122_v19  ;;  %v1356_v32 = vcombine.high %v126_v23, %v130_v24  ;;  %v1355_v34 = vcombine.low %v126_v23, %v130_v24  ;;  %v154_v42 = vld [vmem:[#allocation5 + $0x1e8] sm:$0xff] }
  0x69   :  { %526 = vmatprep.subr.bf16.mxu1 %v1346_v29  ;;  %608 = vmatprep.subr.bf16.mxu0 %v1350_v30  ;;  %v1370_v53 = vcombine.high %v141_v47, %v145_v48  ;;  %v149_v54 = vld [vmem:[#allocation5 + $0x1c0] sm:$0xff]  ;;  %v1374_v55 = vcombine.high %v143_v49, %v147_v50  ;;  %v151_v57 = vld [vmem:[#allocation5 + $0x1d0] sm:$0xff]  ;;  %v1369_v59 = vcombine.low %v141_v47, %v145_v48  ;;  %v134_v29 = vld [vmem:[#allocation5 + $0x148] sm:$0xff] }
  0x6a   :  { %v153_v56 = vld [vmem:[#allocation5 + $0x1e0] sm:$0xff]  ;;  %v155_v58 = vld [vmem:[#allocation5 + $0x1f0] sm:$0xff]  ;;  %v1373_v60 = vcombine.low %v143_v49, %v147_v50  ;;  %v138_v30 = vld [vmem:[#allocation5 + $0x168] sm:$0xff]  ;;  %v1380_v47 = vcombine.high %v150_v41, %v154_v42 }
  0x6b   :  { %v1378_v61 = vcombine.high %v149_v54, %v153_v56  ;;  %v1382_v62 = vcombine.high %v151_v57, %v155_v58  ;;  %v1377_v2 = vcombine.low %v149_v54, %v153_v56  ;;  %v1381_v4 = vcombine.low %v151_v57, %v155_v58  ;;  %v1510_v8 = vld [vmem:[#allocation8 + $0x4] ss:$8 sps:$4 sm:$0xff]   ;;  %v1508_v14 = vld [vmem:[#allocation8] ss:$8 sps:$4 sm:$0xff]   ;;  %v1513_v15 = vld [vmem:[#allocation8 + $0x14] ss:$8 sps:$4 sm:$0xff]  }
  0x6c   :  { %527 = vmatpush1.bf16.msra.mxu1 %v1345_v35  ;;  %609 = vmatpush1.bf16.msra.mxu0 %v1349_v36  ;;  %v1511_v20 = vld [vmem:[#allocation8 + $0x10] ss:$8 sps:$4 sm:$0xff]   ;;  %v1516_v21 = vld [vmem:[#allocation8 + $0x24] ss:$8 sps:$4 sm:$0xff]   ;;  %v1514_v25 = vld [vmem:[#allocation8 + $0x20] ss:$8 sps:$4 sm:$0xff]   ;;  %v1363_v40 = vcombine.low %v134_v29, %v138_v30 }
  0x6d   :  { %528 = vmatprep.subr.bf16.mxu1 %v1354_v37  ;;  %610 = vmatprep.subr.bf16.mxu0 %v1358_v38  ;;  %v1519_v27 = vld [vmem:[#allocation8 + $0x34] ss:$8 sps:$4 sm:$0xff]   ;;  %v1517_v31 = vld [vmem:[#allocation8 + $0x30] ss:$8 sps:$4 sm:$0xff]   ;;  %v1522_v33 = vld [vmem:[#allocation8 + $0x44] ss:$8 sps:$4 sm:$0xff]   ;;  %v1364_v38 = vcombine.high %v134_v29, %v138_v30 }
  0x6e   :  { %v142_v35 = vld [vmem:[#allocation5 + $0x188] sm:$0xff]  ;;  %v1525_v39 = vld [vmem:[#allocation8 + $0x54] ss:$8 sps:$4 sm:$0xff]   ;;  %v1529_v56 = vld [vmem:[#allocation8 + $0x70] ss:$8 sps:$4 sm:$0xff]  }
  0x6f   :  { %v146_v36 = vld [vmem:[#allocation5 + $0x1a8] sm:$0xff]  ;;  %v96_v48 = vld [vmem:[#allocation5 + $0x18] sm:$0xff] }
  0x70   :  { %529 = vmatpush1.bf16.msra.mxu1 %v1353_v43  ;;  %611 = vmatpush1.bf16.msra.mxu0 %v1357_v44  ;;  %v1520_v37 = vld [vmem:[#allocation8 + $0x40] ss:$8 sps:$4 sm:$0xff]   ;;  %v1523_v43 = vld [vmem:[#allocation8 + $0x50] ss:$8 sps:$4 sm:$0xff]   ;;  %v1372_v44 = vcombine.high %v142_v35, %v146_v36  ;;  %v1534_v57 = vld [vmem:[#allocation8 + $0x84] ss:$8 sps:$4 sm:$0xff]  }
  0x71   :  { %530 = vmatprep.subr.bf16.mxu1 %v1362_v45  ;;  %612 = vmatprep.subr.bf16.mxu0 %v1366_v46  ;;  %v1528_v45 = vld [vmem:[#allocation8 + $0x64] ss:$8 sps:$4 sm:$0xff]   ;;  %v1371_v46 = vcombine.low %v142_v35, %v146_v36  ;;  %v100_v49 = vld [vmem:[#allocation5 + $0x38] sm:$0xff]  ;;  %v1526_v50 = vld [vmem:[#allocation8 + $0x60] ss:$8 sps:$4 sm:$0xff]  }
  0x72   :  { %v104_v54 = vld [vmem:[#allocation5 + $0x58] sm:$0xff]  ;;  %v1327_v58 = vcombine.low %v96_v48, %v100_v49  ;;  %v1540_v6 = vld [vmem:[#allocation8 + $0xa4] ss:$8 sps:$4 sm:$0xff]   ;;  %v1538_v12 = vld [vmem:[#allocation8 + $0xa0] ss:$8 sps:$4 sm:$0xff]  }
  0x73   :  { %v1537_v63 = vld [vmem:[#allocation8 + $0x94] ss:$8 sps:$4 sm:$0xff]   ;;  %v1546_v18 = vld [vmem:[#allocation8 + $0xc4] ss:$8 sps:$4 sm:$0xff]   ;;  %v1544_v23 = vld [vmem:[#allocation8 + $0xc0] ss:$8 sps:$4 sm:$0xff]  }
  0x74   :  { %531 = vmatpush1.bf16.msra.mxu1 %v1361_v51  ;;  %613 = vmatpush1.bf16.msra.mxu0 %v1365_v52  ;;  %v1531_v51 = vld [vmem:[#allocation8 + $0x74] ss:$8 sps:$4 sm:$0xff]   ;;  %v1379_v52 = vcombine.low %v150_v41, %v154_v42  ;;  %v1547_v29 = vld [vmem:[#allocation8 + $0xd0] ss:$8 sps:$4 sm:$0xff]   ;;  %v1608_v42 = vld [vmem:[#allocation10 + $0x20] sm:$0xff]  }
  0x75   :  { %532 = vmatprep.subr.bf16.mxu1 %v1370_v53  ;;  %614 = vmatprep.subr.bf16.mxu0 %v1374_v55  ;;  %v1328_v53 = vcombine.high %v96_v48, %v100_v49  ;;  %v108_v55 = vld [vmem:[#allocation5 + $0x78] sm:$0xff]  ;;  %v1607_v41 = vld [vmem:[#allocation10 + $0x18] sm:$0xff]  }
  0x76   :  { %v1335_v1 = vcombine.low %v104_v54, %v108_v55  ;;  %v120_v3 = vld [vmem:[#allocation5 + $0xd8] sm:$0xff] }
  0x77   :  { %v1543_v13 = vld [vmem:[#allocation8 + $0xb4] ss:$8 sps:$4 sm:$0xff]   ;;  %v1553_v36 = vld [vmem:[#allocation8 + $0xf0] ss:$8 sps:$4 sm:$0xff]  }
  0x78   :  { %533 = vmatpush1.bf16.msra.mxu1 %v1369_v59  ;;  %615 = vmatpush1.bf16.msra.mxu0 %v1373_v60  ;;  %v1336_v59 = vcombine.high %v104_v54, %v108_v55  ;;  %v112_v60 = vld [vmem:[#allocation5 + $0x98] sm:$0xff] }
  0x79   :  { %534 = vmatprep.subr.bf16.mxu1 %v1378_v61  ;;  %616 = vmatprep.subr.bf16.mxu0 %v1382_v62  ;;  %v116_v61 = vld [vmem:[#allocation5 + $0xb8] sm:$0xff]  ;;  %v1532_v62 = vld [vmem:[#allocation8 + $0x80] ss:$8 sps:$4 sm:$0xff]  }
  0x7a   :  { %v1343_v7 = vcombine.low %v112_v60, %v116_v61  ;;  %v1549_v24 = vld [vmem:[#allocation8 + $0xd4] ss:$8 sps:$4 sm:$0xff]  }
  0x7b   :  { %v1555_v35 = vld [vmem:[#allocation8 + $0xf4] ss:$8 sps:$4 sm:$0xff]  }
  0x7c   :  { %535 = vmatpush1.bf16.msra.mxu1 %v1377_v2  ;;  %617 = vmatpush1.bf16.msra.mxu0 %v1381_v4  ;;  %v1344_v2 = vcombine.high %v112_v60, %v116_v61  ;;  %v124_v4 = vld [vmem:[#allocation5 + $0xf8] sm:$0xff] }
  0x7d   :  { %561 = vmatprep.subr.bf16.mxu1 %v1324_v5  ;;  %1096 = vmatprep.subr.bf16.mxu0 %v1510_v8  ;;  %v1535_v5 = vld [vmem:[#allocation8 + $0x90] ss:$8 sps:$4 sm:$0xff]   ;;  %v1352_v8 = vcombine.high %v120_v3, %v124_v4 }
  0x7f   :  { %553 = vmatmul.mubr.bf16.vlgmr.msra.gmra.mrb[0].mxu1 %v1873_v9  ;;  %635 = vmatmul.mubr.bf16.vlgmr.msra.gmra.mrb[0].mxu0 %v1873_v9 }
  0x80   :  { %562 = vmatpush1.bf16.msra.mxu1 %v1323_v10  ;;  %593 = vmatprep.mubr.bf16.mxu1 %v1767_v0  ;;  %v128_v10 = vld [vmem:[#allocation5 + $0x118] sm:$0xff] }
  0x81   :  { %563 = vmatprep.subr.bf16.mxu1 %v1332_v11  ;;  %1097 = vmatpush1.bf16.msra.mxu0 %v1508_v14  ;;  %v132_v11 = vld [vmem:[#allocation5 + $0x138] sm:$0xff] }
  0x82   :  { %1098 = vmatprep.subr.bf16.mxu0 %v1513_v15  ;;  %v1360_v14 = vcombine.high %v128_v10, %v132_v11  ;;  %v136_v15 = vld [vmem:[#allocation5 + $0x158] sm:$0xff]  ;;  %v1359_v19 = vcombine.low %v128_v10, %v132_v11 }
  0x84   :  { %564 = vmatpush1.bf16.msra.mxu1 %v1331_v16  ;;  %v140_v16 = vld [vmem:[#allocation5 + $0x178] sm:$0xff] }
  0x85   :  { %565 = vmatprep.subr.bf16.mxu1 %v1340_v17  ;;  %1099 = vmatpush1.bf16.msra.mxu0 %v1511_v20  ;;  %v1541_v17 = vld [vmem:[#allocation8 + $0xb0] ss:$8 sps:$4 sm:$0xff]   ;;  %v1368_v20 = vcombine.high %v136_v15, %v140_v16 }
  0x86   :  { %1100 = vmatprep.subr.bf16.mxu0 %v1516_v21  ;;  %v144_v21 = vld [vmem:[#allocation5 + $0x198] sm:$0xff] }
  0x88   :  { %566 = vmatpush1.bf16.msra.mxu1 %v1339_v22  ;;  %v148_v22 = vld [vmem:[#allocation5 + $0x1b8] sm:$0xff] }
  0x89   :  { %567 = vmatprep.subr.bf16.mxu1 %v1348_v26  ;;  %1101 = vmatpush1.bf16.msra.mxu0 %v1514_v25  ;;  %v1367_v25 = vcombine.low %v136_v15, %v140_v16  ;;  %v1376_v26 = vcombine.high %v144_v21, %v148_v22  ;;  %v1375_v30 = vcombine.low %v144_v21, %v148_v22  ;;  %v1564_v15 = vld [vmem:[#allocation8 + $0x124] ss:$8 sps:$4 sm:$0xff]   ;;  %v1562_v16 = vld [vmem:[#allocation8 + $0x120] ss:$8 sps:$4 sm:$0xff]   ;;  %v1573_v21 = vld [vmem:[#allocation8 + $0x154] ss:$8 sps:$4 sm:$0xff]  }
  0x8a   :  { %1102 = vmatprep.subr.bf16.mxu0 %v1519_v27  ;;  %v152_v27 = vld [vmem:[#allocation5 + $0x1d8] sm:$0xff] }
  0x8b   :  { %v1571_v22 = vld [vmem:[#allocation8 + $0x150] ss:$8 sps:$4 sm:$0xff]  }
  0x8c   :  { %568 = vmatpush1.bf16.msra.mxu1 %v1347_v28  ;;  %v156_v28 = vld [vmem:[#allocation5 + $0x1f8] sm:$0xff] }
  0x8d   :  { %569 = vmatprep.subr.bf16.mxu1 %v1356_v32  ;;  %1103 = vmatpush1.bf16.msra.mxu0 %v1517_v31  ;;  %v1384_v31 = vcombine.high %v152_v27, %v156_v28  ;;  %v1383_v32 = vcombine.low %v152_v27, %v156_v28  ;;  %v1579_v28 = vld [vmem:[#allocation8 + $0x174] ss:$8 sps:$4 sm:$0xff]  }
  0x8e   :  { %1104 = vmatprep.subr.bf16.mxu0 %v1522_v33  ;;  %v1552_v33 = vld [vmem:[#allocation8 + $0xe4] ss:$8 sps:$4 sm:$0xff]  }
  0x90   :  { %570 = vmatpush1.bf16.msra.mxu1 %v1355_v34  ;;  %v1550_v34 = vld [vmem:[#allocation8 + $0xe0] ss:$8 sps:$4 sm:$0xff]  }
  0x91   :  { %571 = vmatprep.subr.bf16.mxu1 %v1364_v38  ;;  %1105 = vmatpush1.bf16.msra.mxu0 %v1520_v37  ;;  %v1558_v37 = vld [vmem:[#allocation8 + $0x104] ss:$8 sps:$4 sm:$0xff]  }
  0x92   :  { %1106 = vmatprep.subr.bf16.mxu0 %v1525_v39  ;;  %v1604_v38 = vld [vmem:[#allocation10] sm:$0xff]   ;;  %v1768_v39 = vmov 0.0  }
  0x94   :  { %572 = vmatpush1.bf16.msra.mxu1 %v1363_v40  ;;  %v1605_v40 = vld [vmem:[#allocation10 + $0x8] sm:$0xff]  }
  0x95   :  { %573 = vmatprep.subr.bf16.mxu1 %v1372_v44  ;;  %1107 = vmatpush1.bf16.msra.mxu0 %v1523_v43  ;;  %v1609_v43 = vld [vmem:[#allocation10 + $0x28] sm:$0xff]   ;;  %v160_v44 = vlaneseq }
  0x96   :  { %1108 = vmatprep.subr.bf16.mxu0 %v1528_v45 }
  0x97   :  { %v1888_v45 = vshrl.u32 %v160_v44, 7  ;;  %v1597_v44 = vld [vmem:[#allocation8 + $0x1d4] ss:$8 sps:$4 sm:$0xff]  }
  0x98   :  { %574 = vmatpush1.bf16.msra.mxu1 %v1371_v46 }
  0x99   :  { %575 = vmatprep.subr.bf16.mxu1 %v1380_v47  ;;  %1109 = vmatpush1.bf16.msra.mxu0 %v1526_v50  ;;  %v162_v46 = vsub.s32 0, %v1888_v45  ;;  %v1891_v47 = vld [vmem:[#allocation7] sm:$0xff]  ;;  %v178_v48 = vsub.s32 4, %v1888_v45  ;;  %v166_v49 = vsub.s32 1, %v1888_v45  ;;  %v182_v50 = vsub.s32 5, %v1888_v45 }
  0x9a   :  { %1110 = vmatprep.subr.bf16.mxu0 %v1531_v51 }
  0x9b   :  { %v163_v51 = vrot.slane %v1891_v47, %v162_v46  ;;  %v183_v54 = vrot.slane %v1891_v47, %v182_v50 }
  0x9c   :  { %576 = vmatpush1.bf16.msra.mxu1 %v1379_v52  ;;  %v179_v52 = vrot.slane %v1891_v47, %v178_v48  ;;  %v190_v48 = vsub.s32 7, %v1888_v45 }
  0x9d   :  { %643 = vmatprep.subr.bf16.mxu1 %v1328_v53  ;;  %1111 = vmatpush1.bf16.msra.mxu0 %v1529_v56  ;;  %v167_v53 = vrot.slane %v1891_v47, %v166_v49 }
  0x9e   :  { %1112 = vmatprep.subr.bf16.mxu0 %v1534_v57 }
  0x9f   :  { %594 = vmatmul.mubr.bf16.vlgmr.msra.gmra.mrb[4].mxu1 %v1873_v9 }
  0xa0   :  { %644 = vmatpush1.bf16.msra.mxu1 %v1327_v58  ;;  %675 = vmatprep.mubr.bf16.mxu1 %v1767_v0  ;;  %v1351_v0 = vcombine.low %v120_v3, %v124_v4 }
  0xa1   :  { %645 = vmatprep.subr.bf16.mxu1 %v1336_v59  ;;  %1113 = vmatpush1.bf16.msra.mxu0 %v1532_v62 }
  0xa2   :  { %1114 = vmatprep.subr.bf16.mxu0 %v1537_v63 }
  0xa4   :  { %646 = vmatpush1.bf16.msra.mxu1 %v1335_v1 }
  0xa5   :  { %647 = vmatprep.subr.bf16.mxu1 %v1344_v2  ;;  %1115 = vmatpush1.bf16.msra.mxu0 %v1535_v5 }
  0xa6   :  { %1116 = vmatprep.subr.bf16.mxu0 %v1540_v6 }
  0xa8   :  { %648 = vmatpush1.bf16.msra.mxu1 %v1343_v7 }
  0xa9   :  { %649 = vmatprep.subr.bf16.mxu1 %v1352_v8  ;;  %1117 = vmatpush1.bf16.msra.mxu0 %v1538_v12 }
  0xaa   :  { %1118 = vmatprep.subr.bf16.mxu0 %v1543_v13  ;;  %v1556_v13 = vld [vmem:[#allocation8 + $0x100] ss:$8 sps:$4 sm:$0xff]  }
  0xac   :  { %650 = vmatpush1.bf16.msra.mxu1 %v1351_v0  ;;  %v1561_v0 = vld [vmem:[#allocation8 + $0x114] ss:$8 sps:$4 sm:$0xff]  }
  0xad   :  { %651 = vmatprep.subr.bf16.mxu1 %v1360_v14  ;;  %1119 = vmatpush1.bf16.msra.mxu0 %v1541_v17  ;;  %v1559_v14 = vld [vmem:[#allocation8 + $0x110] ss:$8 sps:$4 sm:$0xff]   ;;  %v1567_v17 = vld [vmem:[#allocation8 + $0x134] ss:$8 sps:$4 sm:$0xff]  }
  0xae   :  { %1120 = vmatprep.subr.bf16.mxu0 %v1546_v18  ;;  %v1565_v18 = vld [vmem:[#allocation8 + $0x130] ss:$8 sps:$4 sm:$0xff]  }
  0xb0   :  { %652 = vmatpush1.bf16.msra.mxu1 %v1359_v19  ;;  %v1570_v19 = vld [vmem:[#allocation8 + $0x144] ss:$8 sps:$4 sm:$0xff]  }
  0xb1   :  { %653 = vmatprep.subr.bf16.mxu1 %v1368_v20  ;;  %1121 = vmatpush1.bf16.msra.mxu0 %v1544_v23  ;;  %v1568_v20 = vld [vmem:[#allocation8 + $0x140] ss:$8 sps:$4 sm:$0xff]   ;;  %v1576_v23 = vld [vmem:[#allocation8 + $0x164] ss:$8 sps:$4 sm:$0xff]  }
  0xb2   :  { %1122 = vmatprep.subr.bf16.mxu0 %v1549_v24 }
  0xb4   :  { %654 = vmatpush1.bf16.msra.mxu1 %v1367_v25 }
  0xb5   :  { %655 = vmatprep.subr.bf16.mxu1 %v1376_v26  ;;  %1123 = vmatpush1.bf16.msra.mxu0 %v1547_v29  ;;  %v1574_v26 = vld [vmem:[#allocation8 + $0x160] ss:$8 sps:$4 sm:$0xff]  }
  0xb6   :  { %1124 = vmatprep.subr.bf16.mxu0 %v1552_v33  ;;  %v1585_v33 = vld [vmem:[#allocation8 + $0x194] ss:$8 sps:$4 sm:$0xff]  }
  0xb8   :  { %656 = vmatpush1.bf16.msra.mxu1 %v1375_v30  ;;  %v1577_v30 = vld [vmem:[#allocation8 + $0x170] ss:$8 sps:$4 sm:$0xff]  }
  0xb9   :  { %657 = vmatprep.subr.bf16.mxu1 %v1384_v31  ;;  %1125 = vmatpush1.bf16.msra.mxu0 %v1550_v34  ;;  %v1582_v31 = vld [vmem:[#allocation8 + $0x184] ss:$8 sps:$4 sm:$0xff]   ;;  %v1583_v34 = vld [vmem:[#allocation8 + $0x190] ss:$8 sps:$4 sm:$0xff]  }
  0xba   :  { %1126 = vmatprep.subr.bf16.mxu0 %v1555_v35  ;;  %v1588_v35 = vld [vmem:[#allocation8 + $0x1a4] ss:$8 sps:$4 sm:$0xff]  }
  0xbc   :  { %658 = vmatpush1.bf16.msra.mxu1 %v1383_v32  ;;  %v1580_v32 = vld [vmem:[#allocation8 + $0x180] ss:$8 sps:$4 sm:$0xff]  }
  0xbd   :  { %1127 = vmatpush1.bf16.msra.mxu0 %v1553_v36  ;;  %1467 = vmatprep.subr.bf16.mxu1 %v1768_v39  ;;  %v1586_v36 = vld [vmem:[#allocation8 + $0x1a0] ss:$8 sps:$4 sm:$0xff]  }
  0xbe   :  { %1137 = vmatprep.subr.bf16.mxu0 %v1558_v37  ;;  %v1591_v37 = vld [vmem:[#allocation8 + $0x1b4] ss:$8 sps:$4 sm:$0xff]  }
  0xbf   :  { %676 = vmatmul.mubr.bf16.vlgmr.msra.gmra.mrb[8].mxu1 %v1873_v9  ;;  %v1606_v9 = vld [vmem:[#allocation10 + $0x10] sm:$0xff]  }
  0xc0   :  { %1468 = vmatpush3.bf16.msra.mxu1 %v1604_v38  ;;  %v1589_v38 = vld [vmem:[#allocation8 + $0x1b0] ss:$8 sps:$4 sm:$0xff]   ;;  %1483 = vmatprep.mubr.msk.bf16.mxu1 %vm1769_vm0, %v1768_v39 }
  0xc1   :  { %1469 = vmatprep.subr.bf16.mxu1 %v1768_v39 }
  0xc4   :  { %1470 = vmatpush3.bf16.msra.mxu1 %v1605_v40  ;;  %v1594_v40 = vld [vmem:[#allocation8 + $0x1c4] ss:$8 sps:$4 sm:$0xff]  }
  0xc5   :  { %1471 = vmatprep.subr.bf16.mxu1 %v1768_v39 }
  0xc8   :  { %1472 = vmatpush3.bf16.msra.mxu1 %v1606_v9  ;;  %v170_v9 = vsub.s32 2, %v1888_v45 }
  0xc9   :  { %1473 = vmatprep.subr.bf16.mxu1 %v1768_v39 }
  0xca   :  { %v171_v50 = vrot.slane %v1891_v47, %v170_v9 }
  0xcc   :  { %1474 = vmatpush3.bf16.msra.mxu1 %v1607_v41  ;;  %v174_v41 = vsub.s32 3, %v1888_v45 }
  0xcd   :  { %1475 = vmatprep.subr.bf16.mxu1 %v1768_v39 }
  0xd0   :  { %1476 = vmatpush3.bf16.msra.mxu1 %v1608_v42  ;;  %v1592_v42 = vld [vmem:[#allocation8 + $0x1c0] ss:$8 sps:$4 sm:$0xff]  }
  0xd1   :  { %1477 = vmatprep.subr.bf16.mxu1 %v1768_v39 }
  0xd4   :  { %1478 = vmatpush3.bf16.msra.mxu1 %v1609_v43  ;;  %v186_v43 = vsub.s32 6, %v1888_v45 }
  0xd5   :  { %1479 = vmatprep.subr.bf16.mxu1 %v1768_v39 }
 0x152   :  { %v554_v55 = vpop.f32.mrb[0].mxu1  ;;  %v636_v57 = vpop.f32.mrb[0].mxu0 }
 0x153   :  { %v555_v56 = vadd.f32 %v554_v55, %v163_v51  ;;  %v556_v58 = vpop.f32.mrb[1].mxu1  ;;  %v637_v59 = vadd.f32 %v636_v57, %v179_v52  ;;  %v638_v61 = vpop.f32.mrb[1].mxu0  ;;  %v175_v51 = vrot.slane %v1891_v47, %v174_v41  ;;  %v1595_v52 = vld [vmem:[#allocation8 + $0x1d0] ss:$8 sps:$4 sm:$0xff]   ;;  %v1600_v55 = vld [vmem:[#allocation8 + $0x1e4] ss:$8 sps:$4 sm:$0xff]  }
 0x154   :  { %v557_v60 = vadd.f32 %v556_v58, %v167_v53  ;;  %v558_v62 = vpop.f32.mrb[2].mxu1  ;;  %v639_v1 = vadd.f32 %v638_v61, %v183_v54  ;;  %v640_v2 = vpop.f32.mrb[2].mxu0  ;;  %v187_v53 = vrot.slane %v1891_v47, %v186_v43  ;;  %v191_v54 = vrot.slane %v1891_v47, %v190_v48  ;;  %v1598_v61 = vld [vmem:[#allocation8 + $0x1e0] ss:$8 sps:$4 sm:$0xff]   ;;  %v1601_v47 = vld [vmem:[#allocation8 + $0x1f0] ss:$8 sps:$4 sm:$0xff]  }
 0x155   :  { %v684_v63 = vmax.f32 %v555_v56, 0.0  ;;  %v559_v3 = vpop.f32.mrb[3].mxu1  ;;  %v688_v4 = vmax.f32 %v637_v59, 0.0  ;;  %v641_v6 = vpop.f32.mrb[3].mxu0 }
 0x156   :  { %v685_v5 = vmax.f32 %v557_v60, 0.0  ;;  %v689_v7 = vmax.f32 %v639_v1, 0.0  ;;  %v1603_v1 = vld [vmem:[#allocation8 + $0x1f4] ss:$8 sps:$4 sm:$0xff]  }
 0x157   :  { %v692_v8 = vmax.f32 %v684_v63, %v688_v4 }
 0x158   :  { %v693_v10 = vmax.f32 %v685_v5, %v689_v7 }
 0x159   :  { %v761_v11 = vpack.c.bf16 %v692_v8, %v692_v8 }
 0x15a   :  { %v762_v12 = vpack.c.bf16 %v693_v10, %v693_v10 }
 0x15c   :  { %1128 = vmatprep.mubr.bf16.mxu0 %v762_v12  ;;  %v1610_v12 = vld [vmem:[#allocation10 + $0x30] sm:$0xff]  }
 0x15d   :  { %1129 = vmatmul.mubr.bf16.vlgmr.msra.gmra.mrb[4].mxu0 %v761_v11  ;;  %1480 = vmatpush3.bf16.msra.mxu1 %v1610_v12 }
 0x15e   :  { %1138 = vmatpush1.bf16.msra.mxu0 %v1556_v13  ;;  %1481 = vmatprep.subr.bf16.mxu1 %v1768_v39  ;;  %v1611_v13 = vld [vmem:[#allocation10 + $0x38] sm:$0xff]  }
 0x15f   :  { %1139 = vmatprep.subr.bf16.mxu0 %v1561_v0  ;;  %v760_v0 = vld [vmem:[%s1940_s4] sm:$0x3]  ;;  %s1770_s4 = smov [#allocation11]  }
 0x160   :  { %s1310_s18 = sshll.u32 %s1770_s4, 4  ;;  %s1311_s18 = int_to_ptr.vmem [resolvable:$true] %s1310_s18 }
 0x161   :  { %1482 = vmatpush3.bf16.msra.mxu1 %v1611_v13  ;;  %p1731_p13 = scmp.lt.s32.totalorder %s1311_s18, %s1311_s18 }
 0x162   :  { %1140 = vmatpush1.bf16.msra.mxu0 %v1559_v14  ;;  %v769_v14 = vrot.slane %v760_v0, %v162_v46 }
 0x163   :  { %1141 = vmatprep.subr.bf16.mxu0 %v1564_v15  ;;  %v773_v15 = vrot.slane %v760_v0, %v166_v49 }
 0x166   :  { %1142 = vmatpush1.bf16.msra.mxu0 %v1562_v16 }
 0x167   :  { %1143 = vmatprep.subr.bf16.mxu0 %v1567_v17 }
 0x16a   :  { %1144 = vmatpush1.bf16.msra.mxu0 %v1565_v18 }
 0x16b   :  { %1145 = vmatprep.subr.bf16.mxu0 %v1570_v19 }
 0x16e   :  { %1146 = vmatpush1.bf16.msra.mxu0 %v1568_v20 }
 0x16f   :  { %1147 = vmatprep.subr.bf16.mxu0 %v1573_v21 }
 0x172   :  { %v595_v24 = vpop.f32.mrb[4].mxu1  ;;  %1148 = vmatpush1.bf16.msra.mxu0 %v1571_v22 }
 0x173   :  { %v597_v25 = vpop.f32.mrb[5].mxu1  ;;  %1149 = vmatprep.subr.bf16.mxu0 %v1576_v23  ;;  %v596_v56 = vadd.f32 %v595_v24, %v171_v50 }
 0x174   :  { %v599_v27 = vpop.f32.mrb[6].mxu1  ;;  %v598_v57 = vadd.f32 %v597_v25, %v175_v51  ;;  %v1449_v25 = vld [vmem:[%s1942_s6] ss:$0 sm:$0xff]  ;;  %s1726_s6 = scalar_lea.vmem %s1311_s18, 128 }
 0x175   :  { %v600_v29 = vpop.f32.mrb[7].mxu1  ;;  %v686_v2 = vmax.f32 %v596_v56, 0.0  ;;  %p1727_p12 = scmp.ne.s32.totalorder %s1311_s18, %s1726_s6  ;;  %p1732_p0 = scmp.lt.s32.totalorder %s1726_s6, %s1726_s6 }
 0x176   :  { %1150 = vmatpush1.bf16.msra.mxu0 %v1574_v26  ;;  %v687_v5 = vmax.f32 %v598_v57, 0.0 }
 0x177   :  { %1151 = vmatprep.subr.bf16.mxu0 %v1579_v28  ;;  %p1733_p1 = por %p1732_p0, %p1731_p13 }
 0x179   :  { %p1734_p2 = pnand %p1733_p1, %p1727_p12 }
 0x17a   :  { %1152 = vmatpush1.bf16.msra.mxu0 %v1577_v30 }
 0x17b   :  { %1153 = vmatprep.subr.bf16.mxu0 %v1582_v31 }
 0x17e   :  { %1154 = vmatpush1.bf16.msra.mxu0 %v1580_v32 }
 0x17f   :  { %1155 = vmatprep.subr.bf16.mxu0 %v1585_v33 }
 0x182   :  { %1156 = vmatpush1.bf16.msra.mxu0 %v1583_v34 }
 0x183   :  { %1157 = vmatprep.subr.bf16.mxu0 %v1588_v35 }
 0x186   :  { %1158 = vmatpush1.bf16.msra.mxu0 %v1586_v36 }
 0x187   :  { %1159 = vmatprep.subr.bf16.mxu0 %v1591_v37 }
 0x18a   :  { %1160 = vmatpush1.bf16.msra.mxu0 %v1589_v38 }
 0x18b   :  { %1161 = vmatprep.subr.bf16.mxu0 %v1594_v40 }
 0x18e   :  { %1162 = vmatpush1.bf16.msra.mxu0 %v1592_v42 }
 0x18f   :  { %1163 = vmatprep.subr.bf16.mxu0 %v1597_v44 }
 0x192   :  { %v677_v58 = vpop.f32.mrb[8].mxu1  ;;  %1164 = vmatpush1.bf16.msra.mxu0 %v1595_v52 }
 0x193   :  { %v678_v59 = vadd.f32 %v677_v58, %v187_v53  ;;  %v679_v60 = vpop.f32.mrb[9].mxu1  ;;  %1165 = vmatprep.subr.bf16.mxu0 %v1600_v55 }
 0x194   :  { %v680_v62 = vadd.f32 %v679_v60, %v191_v54  ;;  %v681_v63 = vpop.f32.mrb[10].mxu1 }
 0x195   :  { %v690_v3 = vmax.f32 %v678_v59, 0.0  ;;  %v682_v4 = vpop.f32.mrb[11].mxu1 }
 0x196   :  { %v691_v6 = vmax.f32 %v680_v62, 0.0  ;;  %1166 = vmatpush1.bf16.msra.mxu0 %v1598_v61 }
 0x197   :  { %v694_v7 = vmax.f32 %v686_v2, %v690_v3  ;;  %1167 = vmatprep.subr.bf16.mxu0 %v1603_v1 }
 0x198   :  { %v695_v8 = vmax.f32 %v687_v5, %v691_v6 }
 0x199   :  { %v763_v11 = vpack.c.bf16 %v694_v7, %v694_v7 }
 0x19a   :  { %v764_v10 = vpack.c.bf16 %v695_v8, %v695_v8  ;;  %1168 = vmatpush1.bf16.msra.mxu0 %v1601_v47 }
 0x19c   :  { %1169 = vmatprep.mubr.bf16.mxu0 %v764_v10 }
 0x19d   :  { %1170 = vmatmul.mubr.bf16.vlgmr.msra.gmra.mrb[4].mxu0 %v763_v11 }
 0x270   :  { %v1171_v16 = vpop.f32.mrb[4].mxu0 }
 0x271   :  { %v1487_v17 = vadd.f32 %v1171_v16, %v769_v14  ;;  %v1173_v18 = vpop.f32.mrb[5].mxu0 }
 0x272   :  { %v1488_v19 = vadd.f32 %v1173_v18, %v773_v15  ;;  %v1175_v20 = vpop.f32.mrb[6].mxu0 }
 0x273   :  { %v1178_v21 = vmax.f32 %v1487_v17, 0.0  ;;  %v1176_v22 = vpop.f32.mrb[7].mxu0 }
 0x274   :  { %v1179_v23 = vmax.f32 %v1488_v19, 0.0 }
 0x276   :  { %v1180_v24 = vmax.f32 %v1178_v21, %v1179_v23 }
 0x278   :  { %v1198_v39 = vpack.c.bf16 %v1180_v24, %v1180_v24 }
 0x27a   :  { %1484 = vmatmul.mubr.bf16.vlgmr.msra.gmra.mrb[12].mxu1 %v1198_v39 }
 0x34d   :  { %v1287_v26 = vpop.f32.mrb[12].mxu1 }
 0x34e   :  { %v1288_v46 = vadd.f32 %v1449_v25, %v1287_v26  ;;  %v1485_v27 = vpop.f32.mrb[13].mxu1 }
 0x34f   :  { %v1290_v45 = vpop.f32.mrb[14].mxu1 }
 0x350   :  { %1293 = vmax.xlane.f32.xlu0 %v1288_v46  ;;  %v1486_v49 = vpop.f32.mrb[15].mxu1 }
 0x3dd   :  { %v1294_v28 = vpop.xlane.xlu0 %1293 }
 0x3de   :  { %v1295_v29 = vsub.f32 %v1288_v46, %v1294_v28 }
 0x3e0   :  { %v1296_v30 = vmul.f32 1.442695, %v1295_v29 }
 0x3e2   :  { %1612 = vpow2.f32 %v1296_v30 }
 0x3ec   :  { %v1613_v31 = vpop.eup %1612 }
 0x3ed   :  { %1298 = vadd.xlane.f32.xlu0 %v1613_v31 }
 0x47a   :  { %v1299_v32 = vpop.xlane.xlu0 %1298 }
 0x47b   :  { %1614 = vlog2.f32 %v1299_v32 }
 0x485   :  { %v1615_v33 = vpop.eup %1614 }
 0x486   :  { %v1301_v34 = vmul.f32 0.6931472, %v1615_v33 }
 0x488   :  { %v1302_v35 = vsub.f32 %v1295_v29, %v1301_v34 }
 0x48a   :  { %1303 = vst [vmem:[#allocation11] sm:$0xff] %v1302_v35 }
 0x48b   :  { %1737 = shalt.err (!%p1734_p2)
}
 0x48c   :  { %s1738_s21 = scalar_lea.hbm %s1943_s7, 128 }
 0x48d   :  { %p1739_p3 = scmp.ne.s32.totalorder %s1943_s7, %s1738_s21  ;;  %p1742_p4 = scmp.lt.u32.totalorder %s1738_s21, %s1943_s7 }
 0x48f   :  { %p1744_p5 = pnand %p1742_p4, %p1739_p3 }
 0x491   :  { %1747 = shalt.err (!%p1744_p5)
}
 0x492   :  { %1313 = dma.vmem_to_hbm [thread:$0]  %s1311_s18, 128, %s1943_s7, [#allocation4]  }
 0x493   :  { %1754 = dma.done.wait [#allocation4], 128  }
 0x494   :  { %1755 = vsyncadd [#allocation4], 4294967168 }
 0x495   :  { %1317 = vsyncpa [#allocation3], 1 }
 0x496   :  { %1318 = vsyncpa [#allocation6], 1 }
 0x497   :  { %1319 = vsyncpa [#allocation9], 1 }
 0x498   :  { %1320 = vsyncpa [#allocation4], 1 }

// kernel: tpu_custom_call.1
= control target key start
LH: loop header
LB: loop body
LE: loop exit
PB: predicated region body
PF: predicated region fallthrough
CT: control target
= control target key end

     0   :  { %12 = vsyncpa [#allocation3], 0  ;;  %s1936_s0 = inlined_call_operand.hbm [shape: f32[8,128], index: 0, kind: input, shape index: {}]   ;;  %s1937_s1 = inlined_call_operand.hbm [shape: bf16[128,1024], index: 1, kind: input, shape index: {}]   ;;  %s1938_s2 = inlined_call_operand.hbm [shape: f32[1,1024], index: 2, kind: input, shape index: {}]   ;;  %s1939_s3 = inlined_call_operand.hbm [shape: bf16[512,256], index: 3, kind: input, shape index: {}]   ;;  %s1940_s4 = inlined_call_operand.vmem [shape: f32[1,256], index: 4, kind: input, shape index: {}]   ;;  %s1941_s5 = inlined_call_operand.hbm [shape: bf16[128,128], index: 5, kind: input, shape index: {}]   ;;  %s1942_s6 = inlined_call_operand.vmem [shape: f32[1,128], index: 6, kind: input, shape index: {}]   ;;  %s1943_s7 = inlined_call_operand.hbm [shape: f32[8,128], index: 7, kind: output, shape index: {}]  }
   0x1   :  { %13 = vsyncpa [#allocation6], 0 }
   0x2   :  { %14 = vsyncpa [#allocation9], 0 }
   0x3   :  { %15 = vsyncpa [#allocation4], 0  ;;  %s1756_s24 = smov [#allocation5]   ;;  %s1616_s28 = scalar_lea.hbm %s1937_s1, 8192 }
   0x4   :  { %s31_s25 = sshll.u32 %s1756_s24, 4  ;;  %p1617_p0 = scmp.ne.s32.totalorder %s1937_s1, %s1616_s28  ;;  %s32_s25 = int_to_ptr.vmem [resolvable:$true] %s31_s25 }
   0x5   :  { %p1620_p1 = scmp.lt.u32.totalorder %s1616_s28, %s1937_s1 }
   0x7   :  { %p1622_p2 = pnand %p1620_p1, %p1617_p0 }
   0x9   :  { %1625 = shalt.err (!%p1622_p2)
}
   0xa   :  { %s1626_s10 = scalar_lea.vmem %s32_s25, 8192  ;;  %p1631_p4 = scmp.lt.s32.totalorder %s32_s25, %s32_s25 }
   0xb   :  { %p1627_p3 = scmp.ne.s32.totalorder %s32_s25, %s1626_s10  ;;  %p1632_p5 = scmp.lt.s32.totalorder %s1626_s10, %s1626_s10 }
   0xd   :  { %p1633_p6 = por %p1632_p5, %p1631_p4 }
   0xf   :  { %p1634_p7 = pnand %p1633_p6, %p1627_p3 }
  0x11   :  { %1637 = shalt.err (!%p1634_p7)
}
  0x12   :  { %s1757_s11 = smov 512   ;;  %s1758_s12 = smov 32  }
  0x13   :  { %37 = dma.hbm_to_vmem [thread:$0]  %s1937_s1, 8192, %s32_s25, [#allocation6], %s1757_s11, %s1757_s11, %s1758_s12  }
  0x14   :  { %s1759_s15 = smov [#allocation8]   ;;  %s1638_s19 = scalar_lea.hbm %s1939_s3, 8192 }
  0x15   :  { %s53_s16 = sshll.u32 %s1759_s15, 4  ;;  %p1639_p8 = scmp.ne.s32.totalorder %s1939_s3, %s1638_s19  ;;  %s54_s16 = int_to_ptr.vmem [resolvable:$true] %s53_s16 }
  0x16   :  { %p1642_p9 = scmp.lt.u32.totalorder %s1638_s19, %s1939_s3 }
  0x18   :  { %p1644_p10 = pnand %p1642_p9, %p1639_p8 }
  0x1a   :  { %1647 = shalt.err (!%p1644_p10)
}
  0x1b   :  { %s1648_s24 = scalar_lea.vmem %s54_s16, 8192  ;;  %p1653_p12 = scmp.lt.s32.totalorder %s54_s16, %s54_s16 }
  0x1c   :  { %p1649_p11 = scmp.ne.s32.totalorder %s54_s16, %s1648_s24  ;;  %p1654_p13 = scmp.lt.s32.totalorder %s1648_s24, %s1648_s24 }
  0x1e   :  { %p1655_p0 = por %p1654_p13, %p1653_p12 }
  0x20   :  { %p1656_p1 = pnand %p1655_p0, %p1649_p11 }
  0x22   :  { %1659 = shalt.err (!%p1656_p1)
}
  0x23   :  { %s1760_s1 = smov 128   ;;  %s1761_s25 = smov 8  }
  0x24   :  { %59 = dma.hbm_to_vmem [thread:$0]  %s1939_s3, 8192, %s54_s16, [#allocation9], %s1760_s1, %s1760_s1, %s1761_s25  }
  0x25   :  { %s1762_s28 = smov [#allocation2]   ;;  %s1763_s30 = smov [#allocation7]  }
  0x26   :  { %s22_s29 = sshll.u32 %s1762_s28, 4  ;;  %s44_s8 = sshll.u32 %s1763_s30, 4  ;;  %s23_s29 = int_to_ptr.vmem [resolvable:$true] %s22_s29  ;;  %s45_s8 = int_to_ptr.vmem [resolvable:$true] %s44_s8 }
  0x27   :  { %s1660_s11 = scalar_lea.hbm %s1936_s0, 128 }
  0x28   :  { %p1661_p2 = scmp.ne.s32.totalorder %s1936_s0, %s1660_s11  ;;  %p1664_p3 = scmp.lt.u32.totalorder %s1660_s11, %s1936_s0 }
  0x2a   :  { %p1666_p4 = pnand %p1664_p3, %p1661_p2 }
  0x2c   :  { %1669 = shalt.err (!%p1666_p4)
}
  0x2d   :  { %s1670_s3 = scalar_lea.vmem %s23_s29, 128  ;;  %p1675_p6 = scmp.lt.s32.totalorder %s23_s29, %s23_s29 }
  0x2e   :  { %p1671_p5 = scmp.ne.s32.totalorder %s23_s29, %s1670_s3  ;;  %p1676_p7 = scmp.lt.s32.totalorder %s1670_s3, %s1670_s3 }
  0x30   :  { %p1677_p8 = por %p1676_p7, %p1675_p6 }
  0x32   :  { %p1678_p9 = pnand %p1677_p8, %p1671_p5 }
  0x34   :  { %1681 = shalt.err (!%p1678_p9)
}
  0x35   :  { %25 = dma.hbm_to_vmem [thread:$0]  %s1936_s0, 128, %s23_s29, [#allocation3]  }
  0x36   :  { %s1682_s20 = scalar_lea.hbm %s1938_s2, 128 }
  0x37   :  { %p1683_p10 = scmp.ne.s32.totalorder %s1938_s2, %s1682_s20  ;;  %p1686_p11 = scmp.lt.u32.totalorder %s1682_s20, %s1938_s2 }
  0x39   :  { %p1688_p12 = pnand %p1686_p11, %p1683_p10 }
  0x3b   :  { %1691 = shalt.err (!%p1688_p12)
}
  0x3c   :  { %s1692_s1 = scalar_lea.vmem %s45_s8, 128  ;;  %p1697_p0 = scmp.lt.s32.totalorder %s45_s8, %s45_s8 }
  0x3d   :  { %p1693_p13 = scmp.ne.s32.totalorder %s45_s8, %s1692_s1  ;;  %p1698_p1 = scmp.lt.s32.totalorder %s1692_s1, %s1692_s1 }
  0x3f   :  { %p1699_p2 = por %p1698_p1, %p1697_p0 }
  0x41   :  { %p1700_p3 = pnand %p1699_p2, %p1693_p13 }
  0x43   :  { %1703 = shalt.err (!%p1700_p3)
}
  0x44   :  { %47 = dma.hbm_to_vmem [thread:$0]  %s1938_s2, 128, %s45_s8, [#allocation6]  }
  0x45   :  { %s1764_s26 = smov [#allocation10]   ;;  %s1704_s30 = scalar_lea.hbm %s1941_s5, 1024 }
  0x46   :  { %s67_s27 = sshll.u32 %s1764_s26, 4  ;;  %p1705_p4 = scmp.ne.s32.totalorder %s1941_s5, %s1704_s30  ;;  %s68_s27 = int_to_ptr.vmem [resolvable:$true] %s67_s27 }
  0x47   :  { %p1708_p5 = scmp.lt.u32.totalorder %s1704_s30, %s1941_s5 }
  0x49   :  { %p1710_p6 = pnand %p1708_p5, %p1705_p4 }
  0x4b   :  { %1713 = shalt.err (!%p1710_p6)
}
  0x4c   :  { %s1714_s13 = scalar_lea.vmem %s68_s27, 1024  ;;  %p1719_p8 = scmp.lt.s32.totalorder %s68_s27, %s68_s27 }
  0x4d   :  { %p1715_p7 = scmp.ne.s32.totalorder %s68_s27, %s1714_s13  ;;  %p1720_p9 = scmp.lt.s32.totalorder %s1714_s13, %s1714_s13 }
  0x4f   :  { %p1721_p10 = por %p1720_p9, %p1719_p8 }
  0x51   :  { %p1722_p11 = pnand %p1721_p10, %p1715_p7 }
  0x53   :  { %1725 = shalt.err (!%p1722_p11)
}
  0x54   :  { %s1765_s2 = smov 64   ;;  %s1766_s8 = smov 4  }
  0x55   :  { %73 = dma.hbm_to_vmem [thread:$0]  %s1941_s5, 1024, %s68_s27, [#allocation9], %s1765_s2, %s1765_s2, %s1766_s8  }
  0x56   :  { %1748 = dma.done.wait [#allocation3], 128  }
  0x57   :  { %1749 = vsyncadd [#allocation3], 4294967168 }
  0x58   :  { %1750 = dma.done.wait [#allocation6], 8320  }
  0x59   :  { %1751 = vsyncadd [#allocation6], 4294958976 }
  0x5a   :  { %1752 = dma.done.wait [#allocation9], 9216  }
  0x5b   :  { %1753 = vsyncadd [#allocation9], 4294958080  ;;  %v1767_v0 = vmov 0   ;;  %v93_v1 = vld [vmem:[#allocation5] sm:$0xff]  ;;  %v95_v3 = vld [vmem:[#allocation5 + $0x10] sm:$0xff]  ;;  %vm1769_vm0 = vmmov 0  }
  0x5c   :  { %552 = vmatprep.mubr.bf16.mxu1 %v1767_v0  ;;  %634 = vmatprep.mubr.bf16.mxu0 %v1767_v0  ;;  %v97_v2 = vld [vmem:[#allocation5 + $0x20] sm:$0xff]  ;;  %v99_v5 = vld [vmem:[#allocation5 + $0x30] sm:$0xff]  ;;  %v94_v63 = vld [vmem:[#allocation5 + $0x8] sm:$0xff] }
  0x5d   :  { %v1322_v4 = vcombine.high %v93_v1, %v97_v2  ;;  %v1321_v6 = vcombine.low %v93_v1, %v97_v2  ;;  %v101_v7 = vld [vmem:[#allocation5 + $0x40] sm:$0xff]  ;;  %v1326_v9 = vcombine.high %v95_v3, %v99_v5  ;;  %v1325_v10 = vcombine.low %v95_v3, %v99_v5  ;;  %v103_v12 = vld [vmem:[#allocation5 + $0x50] sm:$0xff]  ;;  %v98_v1 = vld [vmem:[#allocation5 + $0x28] sm:$0xff] }
  0x5e   :  { %v105_v8 = vld [vmem:[#allocation5 + $0x60] sm:$0xff]  ;;  %v107_v13 = vld [vmem:[#allocation5 + $0x70] sm:$0xff]  ;;  %v92_v3 = vld [vmem:[#allocation2] sm:$0xff]  ;;  %v1324_v5 = vcombine.high %v94_v63, %v98_v1 }
  0x5f   :  { %v1330_v11 = vcombine.high %v101_v7, %v105_v8  ;;  %v109_v14 = vld [vmem:[#allocation5 + $0x80] sm:$0xff]  ;;  %520 = vmatprep.subr.bf16.mxu1 %v1322_v4  ;;  %v1334_v15 = vcombine.high %v103_v12, %v107_v13  ;;  %v111_v17 = vld [vmem:[#allocation5 + $0x90] sm:$0xff]  ;;  %602 = vmatprep.subr.bf16.mxu0 %v1326_v9  ;;  %v1329_v19 = vcombine.low %v101_v7, %v105_v8  ;;  %v106_v7 = vld [vmem:[#allocation5 + $0x68] sm:$0xff] }
  0x60   :  { %v113_v16 = vld [vmem:[#allocation5 + $0xa0] sm:$0xff]  ;;  %v115_v18 = vld [vmem:[#allocation5 + $0xb0] sm:$0xff]  ;;  %521 = vmatpush1.bf16.msra.mxu1 %v1321_v6  ;;  %603 = vmatpush1.bf16.msra.mxu0 %v1325_v10  ;;  %v1333_v20 = vcombine.low %v103_v12, %v107_v13  ;;  %v102_v6 = vld [vmem:[#allocation5 + $0x48] sm:$0xff]  ;;  %v1873_v9 = vpack.c.bf16 %v92_v3, %v92_v3  ;;  %v1323_v10 = vcombine.low %v94_v63, %v98_v1 }
  0x61   :  { %522 = vmatprep.subr.bf16.mxu1 %v1330_v11  ;;  %v1338_v21 = vcombine.high %v109_v14, %v113_v16  ;;  %604 = vmatprep.subr.bf16.mxu0 %v1334_v15  ;;  %v1342_v22 = vcombine.high %v111_v17, %v115_v18  ;;  %v117_v23 = vld [vmem:[#allocation5 + $0xc0] sm:$0xff]  ;;  %v119_v25 = vld [vmem:[#allocation5 + $0xd0] sm:$0xff]  ;;  %v1337_v27 = vcombine.low %v109_v14, %v113_v16  ;;  %v110_v12 = vld [vmem:[#allocation5 + $0x88] sm:$0xff] }
  0x62   :  { %v121_v24 = vld [vmem:[#allocation5 + $0xe0] sm:$0xff]  ;;  %v123_v26 = vld [vmem:[#allocation5 + $0xf0] sm:$0xff]  ;;  %v1341_v28 = vcombine.low %v111_v17, %v115_v18  ;;  %v1332_v11 = vcombine.high %v102_v6, %v106_v7  ;;  %v114_v13 = vld [vmem:[#allocation5 + $0xa8] sm:$0xff]  ;;  %v1331_v16 = vcombine.low %v102_v6, %v106_v7 }
  0x63   :  { %v1346_v29 = vcombine.high %v117_v23, %v121_v24  ;;  %v1350_v30 = vcombine.high %v119_v25, %v123_v26  ;;  %v125_v31 = vld [vmem:[#allocation5 + $0x100] sm:$0xff]  ;;  %v127_v33 = vld [vmem:[#allocation5 + $0x110] sm:$0xff]  ;;  %v1345_v35 = vcombine.low %v117_v23, %v121_v24  ;;  %v1349_v36 = vcombine.low %v119_v25, %v123_v26  ;;  %v118_v18 = vld [vmem:[#allocation5 + $0xc8] sm:$0xff] }
  0x64   :  { %523 = vmatpush1.bf16.msra.mxu1 %v1329_v19  ;;  %605 = vmatpush1.bf16.msra.mxu0 %v1333_v20  ;;  %v129_v32 = vld [vmem:[#allocation5 + $0x120] sm:$0xff]  ;;  %v131_v34 = vld [vmem:[#allocation5 + $0x130] sm:$0xff]  ;;  %v1340_v17 = vcombine.high %v110_v12, %v114_v13  ;;  %v122_v19 = vld [vmem:[#allocation5 + $0xe8] sm:$0xff] }
  0x65   :  { %524 = vmatprep.subr.bf16.mxu1 %v1338_v21  ;;  %606 = vmatprep.subr.bf16.mxu0 %v1342_v22  ;;  %v1354_v37 = vcombine.high %v125_v31, %v129_v32  ;;  %v1358_v38 = vcombine.high %v127_v33, %v131_v34  ;;  %v133_v39 = vld [vmem:[#allocation5 + $0x140] sm:$0xff]  ;;  %v135_v41 = vld [vmem:[#allocation5 + $0x150] sm:$0xff]  ;;  %v1353_v43 = vcombine.low %v125_v31, %v129_v32  ;;  %v126_v23 = vld [vmem:[#allocation5 + $0x108] sm:$0xff] }
  0x66   :  { %v137_v40 = vld [vmem:[#allocation5 + $0x160] sm:$0xff]  ;;  %v139_v42 = vld [vmem:[#allocation5 + $0x170] sm:$0xff]  ;;  %v1357_v44 = vcombine.low %v127_v33, %v131_v34  ;;  %v1339_v22 = vcombine.low %v110_v12, %v114_v13  ;;  %v130_v24 = vld [vmem:[#allocation5 + $0x128] sm:$0xff]  ;;  %v1348_v26 = vcombine.high %v118_v18, %v122_v19 }
  0x67   :  { %v1362_v45 = vcombine.high %v133_v39, %v137_v40  ;;  %v1366_v46 = vcombine.high %v135_v41, %v139_v42  ;;  %v141_v47 = vld [vmem:[#allocation5 + $0x180] sm:$0xff]  ;;  %v143_v49 = vld [vmem:[#allocation5 + $0x190] sm:$0xff]  ;;  %v1361_v51 = vcombine.low %v133_v39, %v137_v40  ;;  %v1365_v52 = vcombine.low %v135_v41, %v139_v42  ;;  %v150_v41 = vld [vmem:[#allocation5 + $0x1c8] sm:$0xff] }
  0x68   :  { %525 = vmatpush1.bf16.msra.mxu1 %v1337_v27  ;;  %607 = vmatpush1.bf16.msra.mxu0 %v1341_v28  ;;  %v145_v48 = vld [vmem:[#allocation5 + $0x1a0] sm:$0xff]  ;;  %v147_v50 = vld [vmem:[#allocation5 + $0x1b0] sm:$0xff]  ;;  %v1347_v28 = vcombine.low %v118_v18, %v122_v19  ;;  %v1356_v32 = vcombine.high %v126_v23, %v130_v24  ;;  %v1355_v34 = vcombine.low %v126_v23, %v130_v24  ;;  %v154_v42 = vld [vmem:[#allocation5 + $0x1e8] sm:$0xff] }
  0x69   :  { %526 = vmatprep.subr.bf16.mxu1 %v1346_v29  ;;  %608 = vmatprep.subr.bf16.mxu0 %v1350_v30  ;;  %v1370_v53 = vcombine.high %v141_v47, %v145_v48  ;;  %v149_v54 = vld [vmem:[#allocation5 + $0x1c0] sm:$0xff]  ;;  %v1374_v55 = vcombine.high %v143_v49, %v147_v50  ;;  %v151_v57 = vld [vmem:[#allocation5 + $0x1d0] sm:$0xff]  ;;  %v1369_v59 = vcombine.low %v141_v47, %v145_v48  ;;  %v134_v29 = vld [vmem:[#allocation5 + $0x148] sm:$0xff] }
  0x6a   :  { %v153_v56 = vld [vmem:[#allocation5 + $0x1e0] sm:$0xff]  ;;  %v155_v58 = vld [vmem:[#allocation5 + $0x1f0] sm:$0xff]  ;;  %v1373_v60 = vcombine.low %v143_v49, %v147_v50  ;;  %v138_v30 = vld [vmem:[#allocation5 + $0x168] sm:$0xff]  ;;  %v1380_v47 = vcombine.high %v150_v41, %v154_v42 }
  0x6b   :  { %v1378_v61 = vcombine.high %v149_v54, %v153_v56  ;;  %v1382_v62 = vcombine.high %v151_v57, %v155_v58  ;;  %v1377_v2 = vcombine.low %v149_v54, %v153_v56  ;;  %v1381_v4 = vcombine.low %v151_v57, %v155_v58  ;;  %v1510_v8 = vld [vmem:[#allocation8 + $0x4] ss:$8 sps:$4 sm:$0xff]   ;;  %v1508_v14 = vld [vmem:[#allocation8] ss:$8 sps:$4 sm:$0xff]   ;;  %v1513_v15 = vld [vmem:[#allocation8 + $0x14] ss:$8 sps:$4 sm:$0xff]  }
  0x6c   :  { %527 = vmatpush1.bf16.msra.mxu1 %v1345_v35  ;;  %609 = vmatpush1.bf16.msra.mxu0 %v1349_v36  ;;  %v1511_v20 = vld [vmem:[#allocation8 + $0x10] ss:$8 sps:$4 sm:$0xff]   ;;  %v1516_v21 = vld [vmem:[#allocation8 + $0x24] ss:$8 sps:$4 sm:$0xff]   ;;  %v1514_v25 = vld [vmem:[#allocation8 + $0x20] ss:$8 sps:$4 sm:$0xff]   ;;  %v1363_v40 = vcombine.low %v134_v29, %v138_v30 }
  0x6d   :  { %528 = vmatprep.subr.bf16.mxu1 %v1354_v37  ;;  %610 = vmatprep.subr.bf16.mxu0 %v1358_v38  ;;  %v1519_v27 = vld [vmem:[#allocation8 + $0x34] ss:$8 sps:$4 sm:$0xff]   ;;  %v1517_v31 = vld [vmem:[#allocation8 + $0x30] ss:$8 sps:$4 sm:$0xff]   ;;  %v1522_v33 = vld [vmem:[#allocation8 + $0x44] ss:$8 sps:$4 sm:$0xff]   ;;  %v1364_v38 = vcombine.high %v134_v29, %v138_v30 }
  0x6e   :  { %v142_v35 = vld [vmem:[#allocation5 + $0x188] sm:$0xff]  ;;  %v1525_v39 = vld [vmem:[#allocation8 + $0x54] ss:$8 sps:$4 sm:$0xff]   ;;  %v1529_v56 = vld [vmem:[#allocation8 + $0x70] ss:$8 sps:$4 sm:$0xff]  }
  0x6f   :  { %v146_v36 = vld [vmem:[#allocation5 + $0x1a8] sm:$0xff]  ;;  %v96_v48 = vld [vmem:[#allocation5 + $0x18] sm:$0xff] }
  0x70   :  { %529 = vmatpush1.bf16.msra.mxu1 %v1353_v43  ;;  %611 = vmatpush1.bf16.msra.mxu0 %v1357_v44  ;;  %v1520_v37 = vld [vmem:[#allocation8 + $0x40] ss:$8 sps:$4 sm:$0xff]   ;;  %v1523_v43 = vld [vmem:[#allocation8 + $0x50] ss:$8 sps:$4 sm:$0xff]   ;;  %v1372_v44 = vcombine.high %v142_v35, %v146_v36  ;;  %v1534_v57 = vld [vmem:[#allocation8 + $0x84] ss:$8 sps:$4 sm:$0xff]  }
  0x71   :  { %530 = vmatprep.subr.bf16.mxu1 %v1362_v45  ;;  %612 = vmatprep.subr.bf16.mxu0 %v1366_v46  ;;  %v1528_v45 = vld [vmem:[#allocation8 + $0x64] ss:$8 sps:$4 sm:$0xff]   ;;  %v1371_v46 = vcombine.low %v142_v35, %v146_v36  ;;  %v100_v49 = vld [vmem:[#allocation5 + $0x38] sm:$0xff]  ;;  %v1526_v50 = vld [vmem:[#allocation8 + $0x60] ss:$8 sps:$4 sm:$0xff]  }
  0x72   :  { %v104_v54 = vld [vmem:[#allocation5 + $0x58] sm:$0xff]  ;;  %v1327_v58 = vcombine.low %v96_v48, %v100_v49  ;;  %v1540_v6 = vld [vmem:[#allocation8 + $0xa4] ss:$8 sps:$4 sm:$0xff]   ;;  %v1538_v12 = vld [vmem:[#allocation8 + $0xa0] ss:$8 sps:$4 sm:$0xff]  }
  0x73   :  { %v1537_v63 = vld [vmem:[#allocation8 + $0x94] ss:$8 sps:$4 sm:$0xff]   ;;  %v1546_v18 = vld [vmem:[#allocation8 + $0xc4] ss:$8 sps:$4 sm:$0xff]   ;;  %v1544_v23 = vld [vmem:[#allocation8 + $0xc0] ss:$8 sps:$4 sm:$0xff]  }
  0x74   :  { %531 = vmatpush1.bf16.msra.mxu1 %v1361_v51  ;;  %613 = vmatpush1.bf16.msra.mxu0 %v1365_v52  ;;  %v1531_v51 = vld [vmem:[#allocation8 + $0x74] ss:$8 sps:$4 sm:$0xff]   ;;  %v1379_v52 = vcombine.low %v150_v41, %v154_v42  ;;  %v1547_v29 = vld [vmem:[#allocation8 + $0xd0] ss:$8 sps:$4 sm:$0xff]   ;;  %v1608_v42 = vld [vmem:[#allocation10 + $0x20] sm:$0xff]  }
  0x75   :  { %532 = vmatprep.subr.bf16.mxu1 %v1370_v53  ;;  %614 = vmatprep.subr.bf16.mxu0 %v1374_v55  ;;  %v1328_v53 = vcombine.high %v96_v48, %v100_v49  ;;  %v108_v55 = vld [vmem:[#allocation5 + $0x78] sm:$0xff]  ;;  %v1607_v41 = vld [vmem:[#allocation10 + $0x18] sm:$0xff]  }
  0x76   :  { %v1335_v1 = vcombine.low %v104_v54, %v108_v55  ;;  %v120_v3 = vld [vmem:[#allocation5 + $0xd8] sm:$0xff] }
  0x77   :  { %v1543_v13 = vld [vmem:[#allocation8 + $0xb4] ss:$8 sps:$4 sm:$0xff]   ;;  %v1553_v36 = vld [vmem:[#allocation8 + $0xf0] ss:$8 sps:$4 sm:$0xff]  }
  0x78   :  { %533 = vmatpush1.bf16.msra.mxu1 %v1369_v59  ;;  %615 = vmatpush1.bf16.msra.mxu0 %v1373_v60  ;;  %v1336_v59 = vcombine.high %v104_v54, %v108_v55  ;;  %v112_v60 = vld [vmem:[#allocation5 + $0x98] sm:$0xff] }
  0x79   :  { %534 = vmatprep.subr.bf16.mxu1 %v1378_v61  ;;  %616 = vmatprep.subr.bf16.mxu0 %v1382_v62  ;;  %v116_v61 = vld [vmem:[#allocation5 + $0xb8] sm:$0xff]  ;;  %v1532_v62 = vld [vmem:[#allocation8 + $0x80] ss:$8 sps:$4 sm:$0xff]  }
  0x7a   :  { %v1343_v7 = vcombine.low %v112_v60, %v116_v61  ;;  %v1549_v24 = vld [vmem:[#allocation8 + $0xd4] ss:$8 sps:$4 sm:$0xff]  }
  0x7b   :  { %v1555_v35 = vld [vmem:[#allocation8 + $0xf4] ss:$8 sps:$4 sm:$0xff]  }
  0x7c   :  { %535 = vmatpush1.bf16.msra.mxu1 %v1377_v2  ;;  %617 = vmatpush1.bf16.msra.mxu0 %v1381_v4  ;;  %v1344_v2 = vcombine.high %v112_v60, %v116_v61  ;;  %v124_v4 = vld [vmem:[#allocation5 + $0xf8] sm:$0xff] }
  0x7d   :  { %561 = vmatprep.subr.bf16.mxu1 %v1324_v5  ;;  %1096 = vmatprep.subr.bf16.mxu0 %v1510_v8  ;;  %v1535_v5 = vld [vmem:[#allocation8 + $0x90] ss:$8 sps:$4 sm:$0xff]   ;;  %v1352_v8 = vcombine.high %v120_v3, %v124_v4 }
  0x7f   :  { %553 = vmatmul.mubr.bf16.vlgmr.msra.gmra.mrb[0].mxu1 %v1873_v9  ;;  %635 = vmatmul.mubr.bf16.vlgmr.msra.gmra.mrb[0].mxu0 %v1873_v9 }
  0x80   :  { %562 = vmatpush1.bf16.msra.mxu1 %v1323_v10  ;;  %593 = vmatprep.mubr.bf16.mxu1 %v1767_v0  ;;  %v128_v10 = vld [vmem:[#allocation5 + $0x118] sm:$0xff] }
  0x81   :  { %563 = vmatprep.subr.bf16.mxu1 %v1332_v11  ;;  %1097 = vmatpush1.bf16.msra.mxu0 %v1508_v14  ;;  %v132_v11 = vld [vmem:[#allocation5 + $0x138] sm:$0xff] }
  0x82   :  { %1098 = vmatprep.subr.bf16.mxu0 %v1513_v15  ;;  %v1360_v14 = vcombine.high %v128_v10, %v132_v11  ;;  %v136_v15 = vld [vmem:[#allocation5 + $0x158] sm:$0xff]  ;;  %v1359_v19 = vcombine.low %v128_v10, %v132_v11 }
  0x84   :  { %564 = vmatpush1.bf16.msra.mxu1 %v1331_v16  ;;  %v140_v16 = vld [vmem:[#allocation5 + $0x178] sm:$0xff] }
  0x85   :  { %565 = vmatprep.subr.bf16.mxu1 %v1340_v17  ;;  %1099 = vmatpush1.bf16.msra.mxu0 %v1511_v20  ;;  %v1541_v17 = vld [vmem:[#allocation8 + $0xb0] ss:$8 sps:$4 sm:$0xff]   ;;  %v1368_v20 = vcombine.high %v136_v15, %v140_v16 }
  0x86   :  { %1100 = vmatprep.subr.bf16.mxu0 %v1516_v21  ;;  %v144_v21 = vld [vmem:[#allocation5 + $0x198] sm:$0xff] }
  0x88   :  { %566 = vmatpush1.bf16.msra.mxu1 %v1339_v22  ;;  %v148_v22 = vld [vmem:[#allocation5 + $0x1b8] sm:$0xff] }
  0x89   :  { %567 = vmatprep.subr.bf16.mxu1 %v1348_v26  ;;  %1101 = vmatpush1.bf16.msra.mxu0 %v1514_v25  ;;  %v1367_v25 = vcombine.low %v136_v15, %v140_v16  ;;  %v1376_v26 = vcombine.high %v144_v21, %v148_v22  ;;  %v1375_v30 = vcombine.low %v144_v21, %v148_v22  ;;  %v1564_v15 = vld [vmem:[#allocation8 + $0x124] ss:$8 sps:$4 sm:$0xff]   ;;  %v1562_v16 = vld [vmem:[#allocation8 + $0x120] ss:$8 sps:$4 sm:$0xff]   ;;  %v1573_v21 = vld [vmem:[#allocation8 + $0x154] ss:$8 sps:$4 sm:$0xff]  }
  0x8a   :  { %1102 = vmatprep.subr.bf16.mxu0 %v1519_v27  ;;  %v152_v27 = vld [vmem:[#allocation5 + $0x1d8] sm:$0xff] }
  0x8b   :  { %v1571_v22 = vld [vmem:[#allocation8 + $0x150] ss:$8 sps:$4 sm:$0xff]  }
  0x8c   :  { %568 = vmatpush1.bf16.msra.mxu1 %v1347_v28  ;;  %v156_v28 = vld [vmem:[#allocation5 + $0x1f8] sm:$0xff] }
  0x8d   :  { %569 = vmatprep.subr.bf16.mxu1 %v1356_v32  ;;  %1103 = vmatpush1.bf16.msra.mxu0 %v1517_v31  ;;  %v1384_v31 = vcombine.high %v152_v27, %v156_v28  ;;  %v1383_v32 = vcombine.low %v152_v27, %v156_v28  ;;  %v1579_v28 = vld [vmem:[#allocation8 + $0x174] ss:$8 sps:$4 sm:$0xff]  }
  0x8e   :  { %1104 = vmatprep.subr.bf16.mxu0 %v1522_v33  ;;  %v1552_v33 = vld [vmem:[#allocation8 + $0xe4] ss:$8 sps:$4 sm:$0xff]  }
  0x90   :  { %570 = vmatpush1.bf16.msra.mxu1 %v1355_v34  ;;  %v1550_v34 = vld [vmem:[#allocation8 + $0xe0] ss:$8 sps:$4 sm:$0xff]  }
  0x91   :  { %571 = vmatprep.subr.bf16.mxu1 %v1364_v38  ;;  %1105 = vmatpush1.bf16.msra.mxu0 %v1520_v37  ;;  %v1558_v37 = vld [vmem:[#allocation8 + $0x104] ss:$8 sps:$4 sm:$0xff]  }
  0x92   :  { %1106 = vmatprep.subr.bf16.mxu0 %v1525_v39  ;;  %v1604_v38 = vld [vmem:[#allocation10] sm:$0xff]   ;;  %v1768_v39 = vmov 0.0  }
  0x94   :  { %572 = vmatpush1.bf16.msra.mxu1 %v1363_v40  ;;  %v1605_v40 = vld [vmem:[#allocation10 + $0x8] sm:$0xff]  }
  0x95   :  { %573 = vmatprep.subr.bf16.mxu1 %v1372_v44  ;;  %1107 = vmatpush1.bf16.msra.mxu0 %v1523_v43  ;;  %v1609_v43 = vld [vmem:[#allocation10 + $0x28] sm:$0xff]   ;;  %v160_v44 = vlaneseq }
  0x96   :  { %1108 = vmatprep.subr.bf16.mxu0 %v1528_v45 }
  0x97   :  { %v1888_v45 = vshrl.u32 %v160_v44, 7  ;;  %v1597_v44 = vld [vmem:[#allocation8 + $0x1d4] ss:$8 sps:$4 sm:$0xff]  }
  0x98   :  { %574 = vmatpush1.bf16.msra.mxu1 %v1371_v46 }
  0x99   :  { %575 = vmatprep.subr.bf16.mxu1 %v1380_v47  ;;  %1109 = vmatpush1.bf16.msra.mxu0 %v1526_v50  ;;  %v162_v46 = vsub.s32 0, %v1888_v45  ;;  %v1891_v47 = vld [vmem:[#allocation7] sm:$0xff]  ;;  %v178_v48 = vsub.s32 4, %v1888_v45  ;;  %v166_v49 = vsub.s32 1, %v1888_v45  ;;  %v182_v50 = vsub.s32 5, %v1888_v45 }
  0x9a   :  { %1110 = vmatprep.subr.bf16.mxu0 %v1531_v51 }
  0x9b   :  { %v163_v51 = vrot.slane %v1891_v47, %v162_v46  ;;  %v183_v54 = vrot.slane %v1891_v47, %v182_v50 }
  0x9c   :  { %576 = vmatpush1.bf16.msra.mxu1 %v1379_v52  ;;  %v179_v52 = vrot.slane %v1891_v47, %v178_v48  ;;  %v190_v48 = vsub.s32 7, %v1888_v45 }
  0x9d   :  { %643 = vmatprep.subr.bf16.mxu1 %v1328_v53  ;;  %1111 = vmatpush1.bf16.msra.mxu0 %v1529_v56  ;;  %v167_v53 = vrot.slane %v1891_v47, %v166_v49 }
  0x9e   :  { %1112 = vmatprep.subr.bf16.mxu0 %v1534_v57 }
  0x9f   :  { %594 = vmatmul.mubr.bf16.vlgmr.msra.gmra.mrb[4].mxu1 %v1873_v9 }
  0xa0   :  { %644 = vmatpush1.bf16.msra.mxu1 %v1327_v58  ;;  %675 = vmatprep.mubr.bf16.mxu1 %v1767_v0  ;;  %v1351_v0 = vcombine.low %v120_v3, %v124_v4 }
  0xa1   :  { %645 = vmatprep.subr.bf16.mxu1 %v1336_v59  ;;  %1113 = vmatpush1.bf16.msra.mxu0 %v1532_v62 }
  0xa2   :  { %1114 = vmatprep.subr.bf16.mxu0 %v1537_v63 }
  0xa4   :  { %646 = vmatpush1.bf16.msra.mxu1 %v1335_v1 }
  0xa5   :  { %647 = vmatprep.subr.bf16.mxu1 %v1344_v2  ;;  %1115 = vmatpush1.bf16.msra.mxu0 %v1535_v5 }
  0xa6   :  { %1116 = vmatprep.subr.bf16.mxu0 %v1540_v6 }
  0xa8   :  { %648 = vmatpush1.bf16.msra.mxu1 %v1343_v7 }
  0xa9   :  { %649 = vmatprep.subr.bf16.mxu1 %v1352_v8  ;;  %1117 = vmatpush1.bf16.msra.mxu0 %v1538_v12 }
  0xaa   :  { %1118 = vmatprep.subr.bf16.mxu0 %v1543_v13  ;;  %v1556_v13 = vld [vmem:[#allocation8 + $0x100] ss:$8 sps:$4 sm:$0xff]  }
  0xac   :  { %650 = vmatpush1.bf16.msra.mxu1 %v1351_v0  ;;  %v1561_v0 = vld [vmem:[#allocation8 + $0x114] ss:$8 sps:$4 sm:$0xff]  }
  0xad   :  { %651 = vmatprep.subr.bf16.mxu1 %v1360_v14  ;;  %1119 = vmatpush1.bf16.msra.mxu0 %v1541_v17  ;;  %v1559_v14 = vld [vmem:[#allocation8 + $0x110] ss:$8 sps:$4 sm:$0xff]   ;;  %v1567_v17 = vld [vmem:[#allocation8 + $0x134] ss:$8 sps:$4 sm:$0xff]  }
  0xae   :  { %1120 = vmatprep.subr.bf16.mxu0 %v1546_v18  ;;  %v1565_v18 = vld [vmem:[#allocation8 + $0x130] ss:$8 sps:$4 sm:$0xff]  }
  0xb0   :  { %652 = vmatpush1.bf16.msra.mxu1 %v1359_v19  ;;  %v1570_v19 = vld [vmem:[#allocation8 + $0x144] ss:$8 sps:$4 sm:$0xff]  }
  0xb1   :  { %653 = vmatprep.subr.bf16.mxu1 %v1368_v20  ;;  %1121 = vmatpush1.bf16.msra.mxu0 %v1544_v23  ;;  %v1568_v20 = vld [vmem:[#allocation8 + $0x140] ss:$8 sps:$4 sm:$0xff]   ;;  %v1576_v23 = vld [vmem:[#allocation8 + $0x164] ss:$8 sps:$4 sm:$0xff]  }
  0xb2   :  { %1122 = vmatprep.subr.bf16.mxu0 %v1549_v24 }
  0xb4   :  { %654 = vmatpush1.bf16.msra.mxu1 %v1367_v25 }
  0xb5   :  { %655 = vmatprep.subr.bf16.mxu1 %v1376_v26  ;;  %1123 = vmatpush1.bf16.msra.mxu0 %v1547_v29  ;;  %v1574_v26 = vld [vmem:[#allocation8 + $0x160] ss:$8 sps:$4 sm:$0xff]  }
  0xb6   :  { %1124 = vmatprep.subr.bf16.mxu0 %v1552_v33  ;;  %v1585_v33 = vld [vmem:[#allocation8 + $0x194] ss:$8 sps:$4 sm:$0xff]  }
  0xb8   :  { %656 = vmatpush1.bf16.msra.mxu1 %v1375_v30  ;;  %v1577_v30 = vld [vmem:[#allocation8 + $0x170] ss:$8 sps:$4 sm:$0xff]  }
  0xb9   :  { %657 = vmatprep.subr.bf16.mxu1 %v1384_v31  ;;  %1125 = vmatpush1.bf16.msra.mxu0 %v1550_v34  ;;  %v1582_v31 = vld [vmem:[#allocation8 + $0x184] ss:$8 sps:$4 sm:$0xff]   ;;  %v1583_v34 = vld [vmem:[#allocation8 + $0x190] ss:$8 sps:$4 sm:$0xff]  }
  0xba   :  { %1126 = vmatprep.subr.bf16.mxu0 %v1555_v35  ;;  %v1588_v35 = vld [vmem:[#allocation8 + $0x1a4] ss:$8 sps:$4 sm:$0xff]  }
  0xbc   :  { %658 = vmatpush1.bf16.msra.mxu1 %v1383_v32  ;;  %v1580_v32 = vld [vmem:[#allocation8 + $0x180] ss:$8 sps:$4 sm:$0xff]  }
  0xbd   :  { %1127 = vmatpush1.bf16.msra.mxu0 %v1553_v36  ;;  %1467 = vmatprep.subr.bf16.mxu1 %v1768_v39  ;;  %v1586_v36 = vld [vmem:[#allocation8 + $0x1a0] ss:$8 sps:$4 sm:$0xff]  }
  0xbe   :  { %1137 = vmatprep.subr.bf16.mxu0 %v1558_v37  ;;  %v1591_v37 = vld [vmem:[#allocation8 + $0x1b4] ss:$8 sps:$4 sm:$0xff]  }
  0xbf   :  { %676 = vmatmul.mubr.bf16.vlgmr.msra.gmra.mrb[8].mxu1 %v1873_v9  ;;  %v1606_v9 = vld [vmem:[#allocation10 + $0x10] sm:$0xff]  }
  0xc0   :  { %1468 = vmatpush3.bf16.msra.mxu1 %v1604_v38  ;;  %v1589_v38 = vld [vmem:[#allocation8 + $0x1b0] ss:$8 sps:$4 sm:$0xff]   ;;  %1483 = vmatprep.mubr.msk.bf16.mxu1 %vm1769_vm0, %v1768_v39 }
  0xc1   :  { %1469 = vmatprep.subr.bf16.mxu1 %v1768_v39 }
  0xc4   :  { %1470 = vmatpush3.bf16.msra.mxu1 %v1605_v40  ;;  %v1594_v40 = vld [vmem:[#allocation8 + $0x1c4] ss:$8 sps:$4 sm:$0xff]  }
  0xc5   :  { %1471 = vmatprep.subr.bf16.mxu1 %v1768_v39 }
  0xc8   :  { %1472 = vmatpush3.bf16.msra.mxu1 %v1606_v9  ;;  %v170_v9 = vsub.s32 2, %v1888_v45 }
  0xc9   :  { %1473 = vmatprep.subr.bf16.mxu1 %v1768_v39 }
  0xca   :  { %v171_v50 = vrot.slane %v1891_v47, %v170_v9 }
  0xcc   :  { %1474 = vmatpush3.bf16.msra.mxu1 %v1607_v41  ;;  %v174_v41 = vsub.s32 3, %v1888_v45 }
  0xcd   :  { %1475 = vmatprep.subr.bf16.mxu1 %v1768_v39 }
  0xd0   :  { %1476 = vmatpush3.bf16.msra.mxu1 %v1608_v42  ;;  %v1592_v42 = vld [vmem:[#allocation8 + $0x1c0] ss:$8 sps:$4 sm:$0xff]  }
  0xd1   :  { %1477 = vmatprep.subr.bf16.mxu1 %v1768_v39 }
  0xd4   :  { %1478 = vmatpush3.bf16.msra.mxu1 %v1609_v43  ;;  %v186_v43 = vsub.s32 6, %v1888_v45 }
  0xd5   :  { %1479 = vmatprep.subr.bf16.mxu1 %v1768_v39 }
 0x152   :  { %v554_v55 = vpop.f32.mrb[0].mxu1  ;;  %v636_v57 = vpop.f32.mrb[0].mxu0 }
 0x153   :  { %v555_v56 = vadd.f32 %v554_v55, %v163_v51  ;;  %v556_v58 = vpop.f32.mrb[1].mxu1  ;;  %v637_v59 = vadd.f32 %v636_v57, %v179_v52  ;;  %v638_v61 = vpop.f32.mrb[1].mxu0  ;;  %v175_v51 = vrot.slane %v1891_v47, %v174_v41  ;;  %v1595_v52 = vld [vmem:[#allocation8 + $0x1d0] ss:$8 sps:$4 sm:$0xff]   ;;  %v1600_v55 = vld [vmem:[#allocation8 + $0x1e4] ss:$8 sps:$4 sm:$0xff]  }
 0x154   :  { %v557_v60 = vadd.f32 %v556_v58, %v167_v53  ;;  %v558_v62 = vpop.f32.mrb[2].mxu1  ;;  %v639_v1 = vadd.f32 %v638_v61, %v183_v54  ;;  %v640_v2 = vpop.f32.mrb[2].mxu0  ;;  %v187_v53 = vrot.slane %v1891_v47, %v186_v43  ;;  %v191_v54 = vrot.slane %v1891_v47, %v190_v48  ;;  %v1598_v61 = vld [vmem:[#allocation8 + $0x1e0] ss:$8 sps:$4 sm:$0xff]   ;;  %v1601_v47 = vld [vmem:[#allocation8 + $0x1f0] ss:$8 sps:$4 sm:$0xff]  }
 0x155   :  { %v684_v63 = vmax.f32 %v555_v56, 0.0  ;;  %v559_v3 = vpop.f32.mrb[3].mxu1  ;;  %v688_v4 = vmax.f32 %v637_v59, 0.0  ;;  %v641_v6 = vpop.f32.mrb[3].mxu0 }
 0x156   :  { %v685_v5 = vmax.f32 %v557_v60, 0.0  ;;  %v689_v7 = vmax.f32 %v639_v1, 0.0  ;;  %v1603_v1 = vld [vmem:[#allocation8 + $0x1f4] ss:$8 sps:$4 sm:$0xff]  }
 0x157   :  { %v692_v8 = vmax.f32 %v684_v63, %v688_v4 }
 0x158   :  { %v693_v10 = vmax.f32 %v685_v5, %v689_v7 }
 0x159   :  { %v761_v11 = vpack.c.bf16 %v692_v8, %v692_v8 }
 0x15a   :  { %v762_v12 = vpack.c.bf16 %v693_v10, %v693_v10 }
 0x15c   :  { %1128 = vmatprep.mubr.bf16.mxu0 %v762_v12  ;;  %v1610_v12 = vld [vmem:[#allocation10 + $0x30] sm:$0xff]  }
 0x15d   :  { %1129 = vmatmul.mubr.bf16.vlgmr.msra.gmra.mrb[4].mxu0 %v761_v11  ;;  %1480 = vmatpush3.bf16.msra.mxu1 %v1610_v12 }
 0x15e   :  { %1138 = vmatpush1.bf16.msra.mxu0 %v1556_v13  ;;  %1481 = vmatprep.subr.bf16.mxu1 %v1768_v39  ;;  %v1611_v13 = vld [vmem:[#allocation10 + $0x38] sm:$0xff]  }
 0x15f   :  { %1139 = vmatprep.subr.bf16.mxu0 %v1561_v0  ;;  %v760_v0 = vld [vmem:[%s1940_s4] sm:$0x3]  ;;  %s1770_s4 = smov [#allocation11]  }
 0x160   :  { %s1310_s18 = sshll.u32 %s1770_s4, 4  ;;  %s1311_s18 = int_to_ptr.vmem [resolvable:$true] %s1310_s18 }
 0x161   :  { %1482 = vmatpush3.bf16.msra.mxu1 %v1611_v13  ;;  %p1731_p13 = scmp.lt.s32.totalorder %s1311_s18, %s1311_s18 }
 0x162   :  { %1140 = vmatpush1.bf16.msra.mxu0 %v1559_v14  ;;  %v769_v14 = vrot.slane %v760_v0, %v162_v46 }
 0x163   :  { %1141 = vmatprep.subr.bf16.mxu0 %v1564_v15  ;;  %v773_v15 = vrot.slane %v760_v0, %v166_v49 }
 0x166   :  { %1142 = vmatpush1.bf16.msra.mxu0 %v1562_v16 }
 0x167   :  { %1143 = vmatprep.subr.bf16.mxu0 %v1567_v17 }
 0x16a   :  { %1144 = vmatpush1.bf16.msra.mxu0 %v1565_v18 }
 0x16b   :  { %1145 = vmatprep.subr.bf16.mxu0 %v1570_v19 }
 0x16e   :  { %1146 = vmatpush1.bf16.msra.mxu0 %v1568_v20 }
 0x16f   :  { %1147 = vmatprep.subr.bf16.mxu0 %v1573_v21 }
 0x172   :  { %v595_v24 = vpop.f32.mrb[4].mxu1  ;;  %1148 = vmatpush1.bf16.msra.mxu0 %v1571_v22 }
 0x173   :  { %v597_v25 = vpop.f32.mrb[5].mxu1  ;;  %1149 = vmatprep.subr.bf16.mxu0 %v1576_v23  ;;  %v596_v56 = vadd.f32 %v595_v24, %v171_v50 }
 0x174   :  { %v599_v27 = vpop.f32.mrb[6].mxu1  ;;  %v598_v57 = vadd.f32 %v597_v25, %v175_v51  ;;  %v1449_v25 = vld [vmem:[%s1942_s6] ss:$0 sm:$0xff]  ;;  %s1726_s6 = scalar_lea.vmem %s1311_s18, 128 }
 0x175   :  { %v600_v29 = vpop.f32.mrb[7].mxu1  ;;  %v686_v2 = vmax.f32 %v596_v56, 0.0  ;;  %p1727_p12 = scmp.ne.s32.totalorder %s1311_s18, %s1726_s6  ;;  %p1732_p0 = scmp.lt.s32.totalorder %s1726_s6, %s1726_s6 }
 0x176   :  { %1150 = vmatpush1.bf16.msra.mxu0 %v1574_v26  ;;  %v687_v5 = vmax.f32 %v598_v57, 0.0 }
 0x177   :  { %1151 = vmatprep.subr.bf16.mxu0 %v1579_v28  ;;  %p1733_p1 = por %p1732_p0, %p1731_p13 }
 0x179   :  { %p1734_p2 = pnand %p1733_p1, %p1727_p12 }
 0x17a   :  { %1152 = vmatpush1.bf16.msra.mxu0 %v1577_v30 }
 0x17b   :  { %1153 = vmatprep.subr.bf16.mxu0 %v1582_v31 }
 0x17e   :  { %1154 = vmatpush1.bf16.msra.mxu0 %v1580_v32 }
 0x17f   :  { %1155 = vmatprep.subr.bf16.mxu0 %v1585_v33 }
 0x182   :  { %1156 = vmatpush1.bf16.msra.mxu0 %v1583_v34 }
 0x183   :  { %1157 = vmatprep.subr.bf16.mxu0 %v1588_v35 }
 0x186   :  { %1158 = vmatpush1.bf16.msra.mxu0 %v1586_v36 }
 0x187   :  { %1159 = vmatprep.subr.bf16.mxu0 %v1591_v37 }
 0x18a   :  { %1160 = vmatpush1.bf16.msra.mxu0 %v1589_v38 }
 0x18b   :  { %1161 = vmatprep.subr.bf16.mxu0 %v1594_v40 }
 0x18e   :  { %1162 = vmatpush1.bf16.msra.mxu0 %v1592_v42 }
 0x18f   :  { %1163 = vmatprep.subr.bf16.mxu0 %v1597_v44 }
 0x192   :  { %v677_v58 = vpop.f32.mrb[8].mxu1  ;;  %1164 = vmatpush1.bf16.msra.mxu0 %v1595_v52 }
 0x193   :  { %v678_v59 = vadd.f32 %v677_v58, %v187_v53  ;;  %v679_v60 = vpop.f32.mrb[9].mxu1  ;;  %1165 = vmatprep.subr.bf16.mxu0 %v1600_v55 }
 0x194   :  { %v680_v62 = vadd.f32 %v679_v60, %v191_v54  ;;  %v681_v63 = vpop.f32.mrb[10].mxu1 }
 0x195   :  { %v690_v3 = vmax.f32 %v678_v59, 0.0  ;;  %v682_v4 = vpop.f32.mrb[11].mxu1 }
 0x196   :  { %v691_v6 = vmax.f32 %v680_v62, 0.0  ;;  %1166 = vmatpush1.bf16.msra.mxu0 %v1598_v61 }
 0x197   :  { %v694_v7 = vmax.f32 %v686_v2, %v690_v3  ;;  %1167 = vmatprep.subr.bf16.mxu0 %v1603_v1 }
 0x198   :  { %v695_v8 = vmax.f32 %v687_v5, %v691_v6 }
 0x199   :  { %v763_v11 = vpack.c.bf16 %v694_v7, %v694_v7 }
 0x19a   :  { %v764_v10 = vpack.c.bf16 %v695_v8, %v695_v8  ;;  %1168 = vmatpush1.bf16.msra.mxu0 %v1601_v47 }
 0x19c   :  { %1169 = vmatprep.mubr.bf16.mxu0 %v764_v10 }
 0x19d   :  { %1170 = vmatmul.mubr.bf16.vlgmr.msra.gmra.mrb[4].mxu0 %v763_v11 }
 0x270   :  { %v1171_v16 = vpop.f32.mrb[4].mxu0 }
 0x271   :  { %v1487_v17 = vadd.f32 %v1171_v16, %v769_v14  ;;  %v1173_v18 = vpop.f32.mrb[5].mxu0 }
 0x272   :  { %v1488_v19 = vadd.f32 %v1173_v18, %v773_v15  ;;  %v1175_v20 = vpop.f32.mrb[6].mxu0 }
 0x273   :  { %v1178_v21 = vmax.f32 %v1487_v17, 0.0  ;;  %v1176_v22 = vpop.f32.mrb[7].mxu0 }
 0x274   :  { %v1179_v23 = vmax.f32 %v1488_v19, 0.0 }
 0x276   :  { %v1180_v24 = vmax.f32 %v1178_v21, %v1179_v23 }
 0x278   :  { %v1198_v39 = vpack.c.bf16 %v1180_v24, %v1180_v24 }
 0x27a   :  { %1484 = vmatmul.mubr.bf16.vlgmr.msra.gmra.mrb[12].mxu1 %v1198_v39 }
 0x34d   :  { %v1287_v26 = vpop.f32.mrb[12].mxu1 }
 0x34e   :  { %v1288_v46 = vadd.f32 %v1449_v25, %v1287_v26  ;;  %v1485_v27 = vpop.f32.mrb[13].mxu1 }
 0x34f   :  { %v1290_v45 = vpop.f32.mrb[14].mxu1 }
 0x350   :  { %1293 = vmax.xlane.f32.xlu0 %v1288_v46  ;;  %v1486_v49 = vpop.f32.mrb[15].mxu1 }
 0x3dd   :  { %v1294_v28 = vpop.xlane.xlu0 %1293 }
 0x3de   :  { %v1295_v29 = vsub.f32 %v1288_v46, %v1294_v28 }
 0x3e0   :  { %v1296_v30 = vmul.f32 1.442695, %v1295_v29 }
 0x3e2   :  { %1612 = vpow2.f32 %v1296_v30 }
 0x3ec   :  { %v1613_v31 = vpop.eup %1612 }
 0x3ed   :  { %1298 = vadd.xlane.f32.xlu0 %v1613_v31 }
 0x47a   :  { %v1299_v32 = vpop.xlane.xlu0 %1298 }
 0x47b   :  { %1614 = vlog2.f32 %v1299_v32 }
 0x485   :  { %v1615_v33 = vpop.eup %1614 }
 0x486   :  { %v1301_v34 = vmul.f32 0.6931472, %v1615_v33 }
 0x488   :  { %v1302_v35 = vsub.f32 %v1295_v29, %v1301_v34 }
 0x48a   :  { %1303 = vst [vmem:[#allocation11] sm:$0xff] %v1302_v35 }
 0x48b   :  { %1737 = shalt.err (!%p1734_p2)
}
 0x48c   :  { %s1738_s21 = scalar_lea.hbm %s1943_s7, 128 }
 0x48d   :  { %p1739_p3 = scmp.ne.s32.totalorder %s1943_s7, %s1738_s21  ;;  %p1742_p4 = scmp.lt.u32.totalorder %s1738_s21, %s1943_s7 }
 0x48f   :  { %p1744_p5 = pnand %p1742_p4, %p1739_p3 }
 0x491   :  { %1747 = shalt.err (!%p1744_p5)
}
 0x492   :  { %1313 = dma.vmem_to_hbm [thread:$0]  %s1311_s18, 128, %s1943_s7, [#allocation4]  }
 0x493   :  { %1754 = dma.done.wait [#allocation4], 128  }
 0x494   :  { %1755 = vsyncadd [#allocation4], 4294967168 }
 0x495   :  { %1317 = vsyncpa [#allocation3], 1 }
 0x496   :  { %1318 = vsyncpa [#allocation6], 1 }
 0x497   :  { %1319 = vsyncpa [#allocation9], 1 }
 0x498   :  { %1320 = vsyncpa [#allocation4], 1 }

</bundles_post_ra>
